<compile_context>
chip_gen: v7x
topology: tpu7x:2x2x1
jax: 0.10.0
libtpu: 0.0.40
codegen_flags: <defaults>
</compile_context>

<pallas_src>
import functools

import jax
import jax.numpy as jnp
from jax.experimental import pallas as pl
from jax.experimental.pallas import tpu as pltpu

N_CH = 16      # conv1 output channels
HIDDEN = 32    # fc1 output features
_LANE = 128
_SUBLANE = 8


def _cdiv(a, b):
    return -(-a // b)


def _round_up(x, m):
    return _cdiv(x, m) * m


def _tpu_generation():
    try:
        kind = jax.devices()[0].device_kind.lower()
    except Exception:
        kind = ""
    if "v5 lite" in kind or "v5e" in kind or "v5lite" in kind:
        return "v5e"
    if "v7" in kind or "tpu7" in kind:
        return "v7x"
    return "v6e"   # v6e + sensible default for anything else


# generation -> (elementwise compute dtype, TC count, vmem_limit_bytes,
#                budget for pipelined buffers + scratch used by the planner)
_GEN_CONFIG = {
    "v5e": (jnp.float32,  1, 64 << 20, 44 << 20),   # no bf16 VPU on v5e
    "v6e": (jnp.bfloat16, 1, 64 << 20, 44 << 20),   # 128 MiB physical VMEM
    "v7x": (jnp.bfloat16, 2, 48 << 20, 24 << 20),   # 64 MiB physical VMEM, 2 TCs
}


def _plan_tiles(batch, hw_pad, n_cores, budget_bytes):
    """Co-tune (batch tile tb, channels-per-K-step ch_blk) against VMEM."""

    def vmem_bytes(tb, ch_blk):
        kb = ch_blk * hw_pad
        x_buf = 2 * tb * hw_pad * 2          # bf16 x tile, double-buffered
        w1_buf = 2 * kb * HIDDEN * 2         # bf16 fc1 chunk, double-buffered
        act = tb * kb * 2                    # bf16 activation-slab scratch
        acc = tb * HIDDEN * 4                # f32 accumulator scratch
        return x_buf + w1_buf + act + acc

    # Batch tile: as large as possible (<=256 rows per MXU push), but at least
    # n_cores tiles when the batch is big enough so both v7x TCs get work.
    n_bt = max(1, _cdiv(batch, 256))
    if n_cores > 1 and batch >= 2 * _SUBLANE:
        n_bt = max(n_bt, n_cores)
    tb = _round_up(max(1, _cdiv(batch, n_bt)), _SUBLANE)

    while True:
        for ch_blk in (16, 8, 4, 2, 1):      # prefer the longest K per MXU push
            if vmem_bytes(tb, ch_blk) <= budget_bytes:
                return tb, ch_blk
        if tb <= _SUBLANE:
            return _SUBLANE, 1               # smallest plan; rely on limit headroom
        tb = max(_SUBLANE, _round_up(tb // 2, _SUBLANE))


def cnn_kernel(cw_ref, cb_ref, x_ref, w1_ref, b1_ref, w2_ref, b2_ref,
               out_ref, acc_ref, act_ref, *, ch_blk, hw_pad, compute_dtype):
    # cw_ref, cb_ref : (16,)        f32  SMEM  conv1 weight / bias scalars
    # x_ref          : (tb, hw_pad) bf16 VMEM  input tile (reused across K steps)
    # w1_ref         : (kb, 32)     bf16 VMEM  fc1 weight chunk, kb = ch_blk*hw_pad
    # b1_ref         : (1, 32)      f32
    # w2_ref         : (1, 32)      f32
    # b2_ref         : (1, 1)       f32
    # out_ref        : (1, 1, tb)   f32        lane-dense output row (batch on lanes)
    # acc_ref        : (tb, 32)     f32  VMEM scratch (persists across K steps)
    # act_ref        : (tb, kb)     bf16 VMEM scratch (activation slab)
    k = pl.program_id(1)

    @pl.when(k == 0)
    def _():
        acc_ref[...] = jnp.zeros_like(acc_ref)

    # Fused conv1x1 + ReLU: build the lane-dense activation slab for this
    # channel chunk from the single x tile.  The per-channel scalars are
    # broadcast in f32 (cheap (1, hw_pad) rows), then the heavy (tb, hw_pad)
    # math runs in compute_dtype (bf16 on v6e/v7x, f32 on v5e).
    for c in range(ch_blk):
        ch = k * ch_blk + c                                   # channel index
        scale = jnp.full((1, hw_pad), cw_ref[ch], jnp.float32).astype(compute_dtype)
        shift = jnp.full((1, hw_pad), cb_ref[ch], jnp.float32).astype(compute_dtype)
        a = jnp.maximum(x_ref[...].astype(compute_dtype) * scale + shift, 0)
        act_ref[:, pl.ds(c * hw_pad, hw_pad)] = a.astype(act_ref.dtype)

    # One long-K MXU contraction per chunk: bf16 inputs, f32 accumulation.
    acc_ref[...] += jnp.dot(act_ref[...], w1_ref[...],
                            preferred_element_type=jnp.float32)

    @pl.when(k == pl.num_programs(1) - 1)
    def _():
        hidden = jnp.maximum(acc_ref[...] + b1_ref[...], 0.0)          # (tb, 32) f32
        # fc2 (32 -> 1), emitted lane-dense: (1, 32) @ (32, tb) -> (1, tb).
        row = jnp.dot(w2_ref[...], hidden.T,
                      preferred_element_type=jnp.float32) + b2_ref[...]
        out_ref[...] = row.reshape(out_ref.shape)


def prepare_params(params, height, width):
    """One-time, parameter-only preprocessing (hoisted out of the forward path)."""
    hw = height * width
    hw_pad = max(_LANE, _round_up(hw, _LANE))
    # PyTorch fc1.weight is (32, 16*H*W) with input index c*HW + h*W + w.
    # Re-layout to (16*hw_pad, 32) with zero rows for the padded spatial cols.
    w1 = params["fc1_w"].reshape(HIDDEN, N_CH, hw)
    w1 = jnp.transpose(w1, (1, 2, 0))                          # (16, HW, 32)
    w1 = jnp.pad(w1, ((0, 0), (0, hw_pad - hw), (0, 0)))       # zero pad rows
    w1 = w1.reshape(N_CH * hw_pad, HIDDEN).astype(jnp.bfloat16)
    return {
        "height": height, "width": width, "hw_pad": hw_pad,
        "conv_w": params["conv_w"].reshape(N_CH).astype(jnp.float32),
        "conv_b": params["conv_b"].reshape(N_CH).astype(jnp.float32),
        "w1": w1,
        "b1": params["fc1_b"].reshape(1, HIDDEN).astype(jnp.float32),
        "w2": params["fc2_w"].reshape(1, HIDDEN).astype(jnp.float32),
        "b2": params["fc2_b"].reshape(1, 1).astype(jnp.float32),
    }


def cnn_forward(x, prep):
    B, C, H, W = x.shape
    assert C == 1, "CNN_Model expects a single input channel (NCHW, C=1)"
    assert (H, W) == (prep["height"], prep["width"])
    hw, hw_pad = H * W, prep["hw_pad"]

    compute_dtype, n_cores, vmem_limit, budget = _GEN_CONFIG[_tpu_generation()]
    tb, ch_blk = _plan_tiles(B, hw_pad, n_cores, budget)
    kb = ch_blk * hw_pad
    n_k = N_CH // ch_blk
    n_bt = _cdiv(B, tb)
    b_pad = n_bt * tb

    # Per-call input plumbing only: flatten, bf16, pad batch + spatial.
    x_flat = x.reshape(B, hw).astype(jnp.bfloat16)
    x_p = jnp.pad(x_flat, ((0, b_pad - B), (0, hw_pad - hw)))

    kernel = functools.partial(cnn_kernel, ch_blk=ch_blk, hw_pad=hw_pad,
                               compute_dtype=compute_dtype)
    out = pl.pallas_call(
        kernel,
        out_shape=jax.ShapeDtypeStruct((n_bt, 1, tb), jnp.float32),
        grid=(n_bt, n_k),
        in_specs=[
            pl.BlockSpec(memory_space=pltpu.MemorySpace.SMEM),       # conv weights
            pl.BlockSpec(memory_space=pltpu.MemorySpace.SMEM),       # conv bias
            pl.BlockSpec((tb, hw_pad), lambda b, k: (b, 0)),         # x tile (reused over k)
            pl.BlockSpec((kb, HIDDEN), lambda b, k: (k, 0)),         # fc1 weight chunk
            pl.BlockSpec((1, HIDDEN), lambda b, k: (0, 0)),          # fc1 bias
            pl.BlockSpec((1, HIDDEN), lambda b, k: (0, 0)),          # fc2 weight row
            pl.BlockSpec((1, 1), lambda b, k: (0, 0)),               # fc2 bias
        ],
        out_specs=pl.BlockSpec((1, 1, tb), lambda b, k: (b, 0, 0)),
        scratch_shapes=[pltpu.VMEM((tb, HIDDEN), jnp.float32),   # fc1 accumulator
                        pltpu.VMEM((tb, kb), jnp.bfloat16)],     # activation slab
        compiler_params=pltpu.CompilerParams(
            dimension_semantics=("parallel", "arbitrary"),
            vmem_limit_bytes=vmem_limit),
    )(prep["conv_w"], prep["conv_b"], x_p,
      prep["w1"], prep["b1"], prep["w2"], prep["b2"])

    return out.reshape(b_pad, 1)[:B]


def init_params(height, width, key):
    """Deterministic synthetic parameters matching the nn.Module shapes
    (PyTorch-style uniform(-1/sqrt(fan_in), 1/sqrt(fan_in)) bounds)."""
    ks = jax.random.split(key, 6)
    fan_conv = 1 * 1 * 1
    fan1 = N_CH * height * width
    fan2 = HIDDEN

    def u(k, shape, fan_in):
        bound = 1.0 / jnp.sqrt(jnp.float32(fan_in))
        return jax.random.uniform(k, shape, jnp.float32, -bound, bound)

    return {
        "conv_w": u(ks[0], (N_CH, 1, 1, 1), fan_conv),
        "conv_b": u(ks[1], (N_CH,), fan_conv),
        "fc1_w":  u(ks[2], (HIDDEN, fan1), fan1),
        "fc1_b":  u(ks[3], (HIDDEN,), fan1),
        "fc2_w":  u(ks[4], (1, HIDDEN), fan2),
        "fc2_b":  u(ks[5], (1,), fan2),
    }


def cnn_ref(x, params):
    """Pure-JAX reference with identical semantics to the PyTorch forward."""
    B = x.shape[0]
    conv = jnp.maximum(
        x * params["conv_w"].reshape(1, N_CH, 1, 1)
        + params["conv_b"].reshape(1, N_CH, 1, 1), 0.0)          # (B, 16, H, W)
    flat = conv.reshape(B, -1)                                   # (B, 16*H*W)
    h = jnp.maximum(flat @ params["fc1_w"].T + params["fc1_b"], 0.0)
    return h @ params["fc2_w"].T + params["fc2_b"]               # (B, 1)


if __name__ == "__main__":
    B, H, W = 2, 8, 8
    key = jax.random.PRNGKey(0)
    kx, kp = jax.random.split(key)

    x = jax.random.normal(kx, (B, 1, H, W), jnp.float32)
    params = init_params(H, W, kp)
    prep = prepare_params(params, H, W)      # parameter prep hoisted out of forward

    out = cnn_forward(x, prep)
    out = jax.block_until_ready(out)

    ref = cnn_ref(x, params)
    assert out.shape == (B, 1), out.shape
    # bf16 x storage + bf16 MXU inputs (f32 accumulation): relaxed tolerance is
    # intentional vs. the f32 reference.
    assert jnp.allclose(out, ref, atol=2e-2, rtol=2e-2), (out, ref)

    print("KERNEL_OK")
</pallas_src>

<mosaic_0001>
module attributes {stable_mosaic.version = 11 : i64} {
  func.func @cnn_kernel(%arg0: i32, %arg1: i32, %arg2: memref<16xf32, #tpu.memory_space<smem>>, %arg3: memref<16xf32, #tpu.memory_space<smem>>, %arg4: memref<8x128xbf16, #tpu.memory_space<vmem>>, %arg5: memref<2048x32xbf16, #tpu.memory_space<vmem>>, %arg6: memref<1x32xf32, #tpu.memory_space<vmem>>, %arg7: memref<1x32xf32, #tpu.memory_space<vmem>>, %arg8: memref<1x1xf32, #tpu.memory_space<vmem>>, %arg9: memref<1x1x8xf32, #tpu.memory_space<vmem>>, %arg10: memref<8x32xf32, #tpu.memory_space<vmem>>, %arg11: memref<8x2048xbf16, #tpu.memory_space<vmem>>) attributes {dimension_semantics = [#tpu.dimension_semantics<parallel>, #tpu.dimension_semantics<arbitrary>], iteration_bounds = array<i64: 1, 1>, scalar_prefetch = 0 : i64, scratch_operands = 2 : i64, tpu.core_type = #tpu.core_type<tc>, window_params = [{transform_indices = @transform_0, window_bounds = array<i64: 16>}, {transform_indices = @transform_1, window_bounds = array<i64: 16>}, {transform_indices = @transform_2, window_bounds = array<i64: 8, 128>}, {transform_indices = @transform_3, window_bounds = array<i64: 2048, 32>}, {pipeline_mode = #tpu.pipeline_mode<synchronous>, transform_indices = @transform_4, window_bounds = array<i64: 1, 32>}, {pipeline_mode = #tpu.pipeline_mode<synchronous>, transform_indices = @transform_5, window_bounds = array<i64: 1, 32>}, {pipeline_mode = #tpu.pipeline_mode<synchronous>, transform_indices = @transform_6, window_bounds = array<i64: 1, 1>}, {transform_indices = @transform_7, window_bounds = array<i64: 1, 1, 8>}]} {
    %c0_i32 = arith.constant 0 : i32
    %0 = arith.cmpi eq, %arg1, %c0_i32 : i32
    %1 = arith.extui %0 : i1 to i32
    %c0_i32_0 = arith.constant 0 : i32
    %2 = arith.cmpi ne, %1, %c0_i32_0 : i32
    scf.if %2 {
      %cst_91 = arith.constant 0.000000e+00 : f32
      %300 = vector.broadcast %cst_91 : f32 to vector<8x32xf32>
      %c0_92 = arith.constant 0 : index
      %c0_93 = arith.constant 0 : index
      %301 = vector.load %arg10[%c0_92, %c0_93] : memref<8x32xf32, #tpu.memory_space<vmem>>, vector<8x32xf32>
      tpu.vector_store %arg10[%c0_92, %c0_93], %300 {strides = array<i32>} : memref<8x32xf32, #tpu.memory_space<vmem>>, vector<8x32xf32>,
    } else {
    }
    %c16_i32 = arith.constant 16 : i32
    %3 = arith.muli %arg1, %c16_i32 : i32
    %c0_i32_1 = arith.constant 0 : i32
    %4 = arith.addi %3, %c0_i32_1 : i32
    %5 = arith.index_cast %4 : i32 to index
    %6 = memref.load %arg2[%5] : memref<16xf32, #tpu.memory_space<smem>>
    %7 = vector.broadcast %6 : f32 to vector<1x128xf32>
    %8 = arith.truncf %7 : vector<1x128xf32> to vector<1x128xbf16>
    %9 = arith.index_cast %4 : i32 to index
    %10 = memref.load %arg3[%9] : memref<16xf32, #tpu.memory_space<smem>>
    %11 = vector.broadcast %10 : f32 to vector<1x128xf32>
    %12 = arith.truncf %11 : vector<1x128xf32> to vector<1x128xbf16>
    %c0 = arith.constant 0 : index
    %c0_2 = arith.constant 0 : index
    %13 = vector.load %arg4[%c0, %c0_2] : memref<8x128xbf16, #tpu.memory_space<vmem>>, vector<8x128xbf16>
    %14 = vector.broadcast %8 : vector<1x128xbf16> to vector<8x128xbf16>
    %15 = arith.mulf %13, %14 : vector<8x128xbf16>
    %16 = vector.broadcast %12 : vector<1x128xbf16> to vector<8x128xbf16>
    %17 = arith.addf %15, %16 : vector<8x128xbf16>
    %cst = arith.constant 0.000000e+00 : bf16
    %18 = vector.broadcast %cst : bf16 to vector<8x128xbf16>
    %19 = arith.maximumf %17, %18 : vector<8x128xbf16>
    %c0_3 = arith.constant 0 : index
    %c0_4 = arith.constant 0 : index
    %20 = vector.load %arg11[%c0_3, %c0_4] : memref<8x2048xbf16, #tpu.memory_space<vmem>>, vector<8x128xbf16>
    tpu.vector_store %arg11[%c0_3, %c0_4], %19 {strides = array<i32>} : memref<8x2048xbf16, #tpu.memory_space<vmem>>, vector<8x128xbf16>,
    %c16_i32_5 = arith.constant 16 : i32
    %21 = arith.muli %arg1, %c16_i32_5 : i32
    %c1_i32 = arith.constant 1 : i32
    %22 = arith.addi %21, %c1_i32 : i32
    %23 = arith.index_cast %22 : i32 to index
    %24 = memref.load %arg2[%23] : memref<16xf32, #tpu.memory_space<smem>>
    %25 = vector.broadcast %24 : f32 to vector<1x128xf32>
    %26 = arith.truncf %25 : vector<1x128xf32> to vector<1x128xbf16>
    %27 = arith.index_cast %22 : i32 to index
    %28 = memref.load %arg3[%27] : memref<16xf32, #tpu.memory_space<smem>>
    %29 = vector.broadcast %28 : f32 to vector<1x128xf32>
    %30 = arith.truncf %29 : vector<1x128xf32> to vector<1x128xbf16>
    %c0_6 = arith.constant 0 : index
    %c0_7 = arith.constant 0 : index
    %31 = vector.load %arg4[%c0_6, %c0_7] : memref<8x128xbf16, #tpu.memory_space<vmem>>, vector<8x128xbf16>
    %32 = vector.broadcast %26 : vector<1x128xbf16> to vector<8x128xbf16>
    %33 = arith.mulf %31, %32 : vector<8x128xbf16>
    %34 = vector.broadcast %30 : vector<1x128xbf16> to vector<8x128xbf16>
    %35 = arith.addf %33, %34 : vector<8x128xbf16>
    %cst_8 = arith.constant 0.000000e+00 : bf16
    %36 = vector.broadcast %cst_8 : bf16 to vector<8x128xbf16>
    %37 = arith.maximumf %35, %36 : vector<8x128xbf16>
    %c0_9 = arith.constant 0 : index
    %c128 = arith.constant 128 : index
    %38 = vector.load %arg11[%c0_9, %c128] : memref<8x2048xbf16, #tpu.memory_space<vmem>>, vector<8x128xbf16>
    tpu.vector_store %arg11[%c0_9, %c128], %37 {strides = array<i32>} : memref<8x2048xbf16, #tpu.memory_space<vmem>>, vector<8x128xbf16>,
    %c16_i32_10 = arith.constant 16 : i32
    %39 = arith.muli %arg1, %c16_i32_10 : i32
    %c2_i32 = arith.constant 2 : i32
    %40 = arith.addi %39, %c2_i32 : i32
    %41 = arith.index_cast %40 : i32 to index
    %42 = memref.load %arg2[%41] : memref<16xf32, #tpu.memory_space<smem>>
    %43 = vector.broadcast %42 : f32 to vector<1x128xf32>
    %44 = arith.truncf %43 : vector<1x128xf32> to vector<1x128xbf16>
    %45 = arith.index_cast %40 : i32 to index
    %46 = memref.load %arg3[%45] : memref<16xf32, #tpu.memory_space<smem>>
    %47 = vector.broadcast %46 : f32 to vector<1x128xf32>
    %48 = arith.truncf %47 : vector<1x128xf32> to vector<1x128xbf16>
    %c0_11 = arith.constant 0 : index
    %c0_12 = arith.constant 0 : index
    %49 = vector.load %arg4[%c0_11, %c0_12] : memref<8x128xbf16, #tpu.memory_space<vmem>>, vector<8x128xbf16>
    %50 = vector.broadcast %44 : vector<1x128xbf16> to vector<8x128xbf16>
    %51 = arith.mulf %49, %50 : vector<8x128xbf16>
    %52 = vector.broadcast %48 : vector<1x128xbf16> to vector<8x128xbf16>
    %53 = arith.addf %51, %52 : vector<8x128xbf16>
    %cst_13 = arith.constant 0.000000e+00 : bf16
    %54 = vector.broadcast %cst_13 : bf16 to vector<8x128xbf16>
    %55 = arith.maximumf %53, %54 : vector<8x128xbf16>
    %c0_14 = arith.constant 0 : index
    %c256 = arith.constant 256 : index
    %56 = vector.load %arg11[%c0_14, %c256] : memref<8x2048xbf16, #tpu.memory_space<vmem>>, vector<8x128xbf16>
    tpu.vector_store %arg11[%c0_14, %c256], %55 {strides = array<i32>} : memref<8x2048xbf16, #tpu.memory_space<vmem>>, vector<8x128xbf16>,
    %c16_i32_15 = arith.constant 16 : i32
    %57 = arith.muli %arg1, %c16_i32_15 : i32
    %c3_i32 = arith.constant 3 : i32
    %58 = arith.addi %57, %c3_i32 : i32
    %59 = arith.index_cast %58 : i32 to index
    %60 = memref.load %arg2[%59] : memref<16xf32, #tpu.memory_space<smem>>
    %61 = vector.broadcast %60 : f32 to vector<1x128xf32>
    %62 = arith.truncf %61 : vector<1x128xf32> to vector<1x128xbf16>
    %63 = arith.index_cast %58 : i32 to index
    %64 = memref.load %arg3[%63] : memref<16xf32, #tpu.memory_space<smem>>
    %65 = vector.broadcast %64 : f32 to vector<1x128xf32>
    %66 = arith.truncf %65 : vector<1x128xf32> to vector<1x128xbf16>
    %c0_16 = arith.constant 0 : index
    %c0_17 = arith.constant 0 : index
    %67 = vector.load %arg4[%c0_16, %c0_17] : memref<8x128xbf16, #tpu.memory_space<vmem>>, vector<8x128xbf16>
    %68 = vector.broadcast %62 : vector<1x128xbf16> to vector<8x128xbf16>
    %69 = arith.mulf %67, %68 : vector<8x128xbf16>
    %70 = vector.broadcast %66 : vector<1x128xbf16> to vector<8x128xbf16>
    %71 = arith.addf %69, %70 : vector<8x128xbf16>
    %cst_18 = arith.constant 0.000000e+00 : bf16
    %72 = vector.broadcast %cst_18 : bf16 to vector<8x128xbf16>
    %73 = arith.maximumf %71, %72 : vector<8x128xbf16>
    %c0_19 = arith.constant 0 : index
    %c384 = arith.constant 384 : index
    %74 = vector.load %arg11[%c0_19, %c384] : memref<8x2048xbf16, #tpu.memory_space<vmem>>, vector<8x128xbf16>
    tpu.vector_store %arg11[%c0_19, %c384], %73 {strides = array<i32>} : memref<8x2048xbf16, #tpu.memory_space<vmem>>, vector<8x128xbf16>,
    %c16_i32_20 = arith.constant 16 : i32
    %75 = arith.muli %arg1, %c16_i32_20 : i32
    %c4_i32 = arith.constant 4 : i32
    %76 = arith.addi %75, %c4_i32 : i32
    %77 = arith.index_cast %76 : i32 to index
    %78 = memref.load %arg2[%77] : memref<16xf32, #tpu.memory_space<smem>>
    %79 = vector.broadcast %78 : f32 to vector<1x128xf32>
    %80 = arith.truncf %79 : vector<1x128xf32> to vector<1x128xbf16>
    %81 = arith.index_cast %76 : i32 to index
    %82 = memref.load %arg3[%81] : memref<16xf32, #tpu.memory_space<smem>>
    %83 = vector.broadcast %82 : f32 to vector<1x128xf32>
    %84 = arith.truncf %83 : vector<1x128xf32> to vector<1x128xbf16>
    %c0_21 = arith.constant 0 : index
    %c0_22 = arith.constant 0 : index
    %85 = vector.load %arg4[%c0_21, %c0_22] : memref<8x128xbf16, #tpu.memory_space<vmem>>, vector<8x128xbf16>
    %86 = vector.broadcast %80 : vector<1x128xbf16> to vector<8x128xbf16>
    %87 = arith.mulf %85, %86 : vector<8x128xbf16>
    %88 = vector.broadcast %84 : vector<1x128xbf16> to vector<8x128xbf16>
    %89 = arith.addf %87, %88 : vector<8x128xbf16>
    %cst_23 = arith.constant 0.000000e+00 : bf16
    %90 = vector.broadcast %cst_23 : bf16 to vector<8x128xbf16>
    %91 = arith.maximumf %89, %90 : vector<8x128xbf16>
    %c0_24 = arith.constant 0 : index
    %c512 = arith.constant 512 : index
    %92 = vector.load %arg11[%c0_24, %c512] : memref<8x2048xbf16, #tpu.memory_space<vmem>>, vector<8x128xbf16>
    tpu.vector_store %arg11[%c0_24, %c512], %91 {strides = array<i32>} : memref<8x2048xbf16, #tpu.memory_space<vmem>>, vector<8x128xbf16>,
    %c16_i32_25 = arith.constant 16 : i32
    %93 = arith.muli %arg1, %c16_i32_25 : i32
    %c5_i32 = arith.constant 5 : i32
    %94 = arith.addi %93, %c5_i32 : i32
    %95 = arith.index_cast %94 : i32 to index
    %96 = memref.load %arg2[%95] : memref<16xf32, #tpu.memory_space<smem>>
    %97 = vector.broadcast %96 : f32 to vector<1x128xf32>
    %98 = arith.truncf %97 : vector<1x128xf32> to vector<1x128xbf16>
    %99 = arith.index_cast %94 : i32 to index
    %100 = memref.load %arg3[%99] : memref<16xf32, #tpu.memory_space<smem>>
    %101 = vector.broadcast %100 : f32 to vector<1x128xf32>
    %102 = arith.truncf %101 : vector<1x128xf32> to vector<1x128xbf16>
    %c0_26 = arith.constant 0 : index
    %c0_27 = arith.constant 0 : index
    %103 = vector.load %arg4[%c0_26, %c0_27] : memref<8x128xbf16, #tpu.memory_space<vmem>>, vector<8x128xbf16>
    %104 = vector.broadcast %98 : vector<1x128xbf16> to vector<8x128xbf16>
    %105 = arith.mulf %103, %104 : vector<8x128xbf16>
    %106 = vector.broadcast %102 : vector<1x128xbf16> to vector<8x128xbf16>
    %107 = arith.addf %105, %106 : vector<8x128xbf16>
    %cst_28 = arith.constant 0.000000e+00 : bf16
    %108 = vector.broadcast %cst_28 : bf16 to vector<8x128xbf16>
    %109 = arith.maximumf %107, %108 : vector<8x128xbf16>
    %c0_29 = arith.constant 0 : index
    %c640 = arith.constant 640 : index
    %110 = vector.load %arg11[%c0_29, %c640] : memref<8x2048xbf16, #tpu.memory_space<vmem>>, vector<8x128xbf16>
    tpu.vector_store %arg11[%c0_29, %c640], %109 {strides = array<i32>} : memref<8x2048xbf16, #tpu.memory_space<vmem>>, vector<8x128xbf16>,
    %c16_i32_30 = arith.constant 16 : i32
    %111 = arith.muli %arg1, %c16_i32_30 : i32
    %c6_i32 = arith.constant 6 : i32
    %112 = arith.addi %111, %c6_i32 : i32
    %113 = arith.index_cast %112 : i32 to index
    %114 = memref.load %arg2[%113] : memref<16xf32, #tpu.memory_space<smem>>
    %115 = vector.broadcast %114 : f32 to vector<1x128xf32>
    %116 = arith.truncf %115 : vector<1x128xf32> to vector<1x128xbf16>
    %117 = arith.index_cast %112 : i32 to index
    %118 = memref.load %arg3[%117] : memref<16xf32, #tpu.memory_space<smem>>
    %119 = vector.broadcast %118 : f32 to vector<1x128xf32>
    %120 = arith.truncf %119 : vector<1x128xf32> to vector<1x128xbf16>
    %c0_31 = arith.constant 0 : index
    %c0_32 = arith.constant 0 : index
    %121 = vector.load %arg4[%c0_31, %c0_32] : memref<8x128xbf16, #tpu.memory_space<vmem>>, vector<8x128xbf16>
    %122 = vector.broadcast %116 : vector<1x128xbf16> to vector<8x128xbf16>
    %123 = arith.mulf %121, %122 : vector<8x128xbf16>
    %124 = vector.broadcast %120 : vector<1x128xbf16> to vector<8x128xbf16>
    %125 = arith.addf %123, %124 : vector<8x128xbf16>
    %cst_33 = arith.constant 0.000000e+00 : bf16
    %126 = vector.broadcast %cst_33 : bf16 to vector<8x128xbf16>
    %127 = arith.maximumf %125, %126 : vector<8x128xbf16>
    %c0_34 = arith.constant 0 : index
    %c768 = arith.constant 768 : index
    %128 = vector.load %arg11[%c0_34, %c768] : memref<8x2048xbf16, #tpu.memory_space<vmem>>, vector<8x128xbf16>
    tpu.vector_store %arg11[%c0_34, %c768], %127 {strides = array<i32>} : memref<8x2048xbf16, #tpu.memory_space<vmem>>, vector<8x128xbf16>,
    %c16_i32_35 = arith.constant 16 : i32
    %129 = arith.muli %arg1, %c16_i32_35 : i32
    %c7_i32 = arith.constant 7 : i32
    %130 = arith.addi %129, %c7_i32 : i32
    %131 = arith.index_cast %130 : i32 to index
    %132 = memref.load %arg2[%131] : memref<16xf32, #tpu.memory_space<smem>>
    %133 = vector.broadcast %132 : f32 to vector<1x128xf32>
    %134 = arith.truncf %133 : vector<1x128xf32> to vector<1x128xbf16>
    %135 = arith.index_cast %130 : i32 to index
    %136 = memref.load %arg3[%135] : memref<16xf32, #tpu.memory_space<smem>>
    %137 = vector.broadcast %136 : f32 to vector<1x128xf32>
    %138 = arith.truncf %137 : vector<1x128xf32> to vector<1x128xbf16>
    %c0_36 = arith.constant 0 : index
    %c0_37 = arith.constant 0 : index
    %139 = vector.load %arg4[%c0_36, %c0_37] : memref<8x128xbf16, #tpu.memory_space<vmem>>, vector<8x128xbf16>
    %140 = vector.broadcast %134 : vector<1x128xbf16> to vector<8x128xbf16>
    %141 = arith.mulf %139, %140 : vector<8x128xbf16>
    %142 = vector.broadcast %138 : vector<1x128xbf16> to vector<8x128xbf16>
    %143 = arith.addf %141, %142 : vector<8x128xbf16>
    %cst_38 = arith.constant 0.000000e+00 : bf16
    %144 = vector.broadcast %cst_38 : bf16 to vector<8x128xbf16>
    %145 = arith.maximumf %143, %144 : vector<8x128xbf16>
    %c0_39 = arith.constant 0 : index
    %c896 = arith.constant 896 : index
    %146 = vector.load %arg11[%c0_39, %c896] : memref<8x2048xbf16, #tpu.memory_space<vmem>>, vector<8x128xbf16>
    tpu.vector_store %arg11[%c0_39, %c896], %145 {strides = array<i32>} : memref<8x2048xbf16, #tpu.memory_space<vmem>>, vector<8x128xbf16>,
    %c16_i32_40 = arith.constant 16 : i32
    %147 = arith.muli %arg1, %c16_i32_40 : i32
    %c8_i32 = arith.constant 8 : i32
    %148 = arith.addi %147, %c8_i32 : i32
    %149 = arith.index_cast %148 : i32 to index
    %150 = memref.load %arg2[%149] : memref<16xf32, #tpu.memory_space<smem>>
    %151 = vector.broadcast %150 : f32 to vector<1x128xf32>
    %152 = arith.truncf %151 : vector<1x128xf32> to vector<1x128xbf16>
    %153 = arith.index_cast %148 : i32 to index
    %154 = memref.load %arg3[%153] : memref<16xf32, #tpu.memory_space<smem>>
    %155 = vector.broadcast %154 : f32 to vector<1x128xf32>
    %156 = arith.truncf %155 : vector<1x128xf32> to vector<1x128xbf16>
    %c0_41 = arith.constant 0 : index
    %c0_42 = arith.constant 0 : index
    %157 = vector.load %arg4[%c0_41, %c0_42] : memref<8x128xbf16, #tpu.memory_space<vmem>>, vector<8x128xbf16>
    %158 = vector.broadcast %152 : vector<1x128xbf16> to vector<8x128xbf16>
    %159 = arith.mulf %157, %158 : vector<8x128xbf16>
    %160 = vector.broadcast %156 : vector<1x128xbf16> to vector<8x128xbf16>
    %161 = arith.addf %159, %160 : vector<8x128xbf16>
    %cst_43 = arith.constant 0.000000e+00 : bf16
    %162 = vector.broadcast %cst_43 : bf16 to vector<8x128xbf16>
    %163 = arith.maximumf %161, %162 : vector<8x128xbf16>
    %c0_44 = arith.constant 0 : index
    %c1024 = arith.constant 1024 : index
    %164 = vector.load %arg11[%c0_44, %c1024] : memref<8x2048xbf16, #tpu.memory_space<vmem>>, vector<8x128xbf16>
    tpu.vector_store %arg11[%c0_44, %c1024], %163 {strides = array<i32>} : memref<8x2048xbf16, #tpu.memory_space<vmem>>, vector<8x128xbf16>,
    %c16_i32_45 = arith.constant 16 : i32
    %165 = arith.muli %arg1, %c16_i32_45 : i32
    %c9_i32 = arith.constant 9 : i32
    %166 = arith.addi %165, %c9_i32 : i32
    %167 = arith.index_cast %166 : i32 to index
    %168 = memref.load %arg2[%167] : memref<16xf32, #tpu.memory_space<smem>>
    %169 = vector.broadcast %168 : f32 to vector<1x128xf32>
    %170 = arith.truncf %169 : vector<1x128xf32> to vector<1x128xbf16>
    %171 = arith.index_cast %166 : i32 to index
    %172 = memref.load %arg3[%171] : memref<16xf32, #tpu.memory_space<smem>>
    %173 = vector.broadcast %172 : f32 to vector<1x128xf32>
    %174 = arith.truncf %173 : vector<1x128xf32> to vector<1x128xbf16>
    %c0_46 = arith.constant 0 : index
    %c0_47 = arith.constant 0 : index
    %175 = vector.load %arg4[%c0_46, %c0_47] : memref<8x128xbf16, #tpu.memory_space<vmem>>, vector<8x128xbf16>
    %176 = vector.broadcast %170 : vector<1x128xbf16> to vector<8x128xbf16>
    %177 = arith.mulf %175, %176 : vector<8x128xbf16>
    %178 = vector.broadcast %174 : vector<1x128xbf16> to vector<8x128xbf16>
    %179 = arith.addf %177, %178 : vector<8x128xbf16>
    %cst_48 = arith.constant 0.000000e+00 : bf16
    %180 = vector.broadcast %cst_48 : bf16 to vector<8x128xbf16>
    %181 = arith.maximumf %179, %180 : vector<8x128xbf16>
    %c0_49 = arith.constant 0 : index
    %c1152 = arith.constant 1152 : index
    %182 = vector.load %arg11[%c0_49, %c1152] : memref<8x2048xbf16, #tpu.memory_space<vmem>>, vector<8x128xbf16>
    tpu.vector_store %arg11[%c0_49, %c1152], %181 {strides = array<i32>} : memref<8x2048xbf16, #tpu.memory_space<vmem>>, vector<8x128xbf16>,
    %c16_i32_50 = arith.constant 16 : i32
    %183 = arith.muli %arg1, %c16_i32_50 : i32
    %c10_i32 = arith.constant 10 : i32
    %184 = arith.addi %183, %c10_i32 : i32
    %185 = arith.index_cast %184 : i32 to index
    %186 = memref.load %arg2[%185] : memref<16xf32, #tpu.memory_space<smem>>
    %187 = vector.broadcast %186 : f32 to vector<1x128xf32>
    %188 = arith.truncf %187 : vector<1x128xf32> to vector<1x128xbf16>
    %189 = arith.index_cast %184 : i32 to index
    %190 = memref.load %arg3[%189] : memref<16xf32, #tpu.memory_space<smem>>
    %191 = vector.broadcast %190 : f32 to vector<1x128xf32>
    %192 = arith.truncf %191 : vector<1x128xf32> to vector<1x128xbf16>
    %c0_51 = arith.constant 0 : index
    %c0_52 = arith.constant 0 : index
    %193 = vector.load %arg4[%c0_51, %c0_52] : memref<8x128xbf16, #tpu.memory_space<vmem>>, vector<8x128xbf16>
    %194 = vector.broadcast %188 : vector<1x128xbf16> to vector<8x128xbf16>
    %195 = arith.mulf %193, %194 : vector<8x128xbf16>
    %196 = vector.broadcast %192 : vector<1x128xbf16> to vector<8x128xbf16>
    %197 = arith.addf %195, %196 : vector<8x128xbf16>
    %cst_53 = arith.constant 0.000000e+00 : bf16
    %198 = vector.broadcast %cst_53 : bf16 to vector<8x128xbf16>
    %199 = arith.maximumf %197, %198 : vector<8x128xbf16>
    %c0_54 = arith.constant 0 : index
    %c1280 = arith.constant 1280 : index
    %200 = vector.load %arg11[%c0_54, %c1280] : memref<8x2048xbf16, #tpu.memory_space<vmem>>, vector<8x128xbf16>
    tpu.vector_store %arg11[%c0_54, %c1280], %199 {strides = array<i32>} : memref<8x2048xbf16, #tpu.memory_space<vmem>>, vector<8x128xbf16>,
    %c16_i32_55 = arith.constant 16 : i32
    %201 = arith.muli %arg1, %c16_i32_55 : i32
    %c11_i32 = arith.constant 11 : i32
    %202 = arith.addi %201, %c11_i32 : i32
    %203 = arith.index_cast %202 : i32 to index
    %204 = memref.load %arg2[%203] : memref<16xf32, #tpu.memory_space<smem>>
    %205 = vector.broadcast %204 : f32 to vector<1x128xf32>
    %206 = arith.truncf %205 : vector<1x128xf32> to vector<1x128xbf16>
    %207 = arith.index_cast %202 : i32 to index
    %208 = memref.load %arg3[%207] : memref<16xf32, #tpu.memory_space<smem>>
    %209 = vector.broadcast %208 : f32 to vector<1x128xf32>
    %210 = arith.truncf %209 : vector<1x128xf32> to vector<1x128xbf16>
    %c0_56 = arith.constant 0 : index
    %c0_57 = arith.constant 0 : index
    %211 = vector.load %arg4[%c0_56, %c0_57] : memref<8x128xbf16, #tpu.memory_space<vmem>>, vector<8x128xbf16>
    %212 = vector.broadcast %206 : vector<1x128xbf16> to vector<8x128xbf16>
    %213 = arith.mulf %211, %212 : vector<8x128xbf16>
    %214 = vector.broadcast %210 : vector<1x128xbf16> to vector<8x128xbf16>
    %215 = arith.addf %213, %214 : vector<8x128xbf16>
    %cst_58 = arith.constant 0.000000e+00 : bf16
    %216 = vector.broadcast %cst_58 : bf16 to vector<8x128xbf16>
    %217 = arith.maximumf %215, %216 : vector<8x128xbf16>
    %c0_59 = arith.constant 0 : index
    %c1408 = arith.constant 1408 : index
    %218 = vector.load %arg11[%c0_59, %c1408] : memref<8x2048xbf16, #tpu.memory_space<vmem>>, vector<8x128xbf16>
    tpu.vector_store %arg11[%c0_59, %c1408], %217 {strides = array<i32>} : memref<8x2048xbf16, #tpu.memory_space<vmem>>, vector<8x128xbf16>,
    %c16_i32_60 = arith.constant 16 : i32
    %219 = arith.muli %arg1, %c16_i32_60 : i32
    %c12_i32 = arith.constant 12 : i32
    %220 = arith.addi %219, %c12_i32 : i32
    %221 = arith.index_cast %220 : i32 to index
    %222 = memref.load %arg2[%221] : memref<16xf32, #tpu.memory_space<smem>>
    %223 = vector.broadcast %222 : f32 to vector<1x128xf32>
    %224 = arith.truncf %223 : vector<1x128xf32> to vector<1x128xbf16>
    %225 = arith.index_cast %220 : i32 to index
    %226 = memref.load %arg3[%225] : memref<16xf32, #tpu.memory_space<smem>>
    %227 = vector.broadcast %226 : f32 to vector<1x128xf32>
    %228 = arith.truncf %227 : vector<1x128xf32> to vector<1x128xbf16>
    %c0_61 = arith.constant 0 : index
    %c0_62 = arith.constant 0 : index
    %229 = vector.load %arg4[%c0_61, %c0_62] : memref<8x128xbf16, #tpu.memory_space<vmem>>, vector<8x128xbf16>
    %230 = vector.broadcast %224 : vector<1x128xbf16> to vector<8x128xbf16>
    %231 = arith.mulf %229, %230 : vector<8x128xbf16>
    %232 = vector.broadcast %228 : vector<1x128xbf16> to vector<8x128xbf16>
    %233 = arith.addf %231, %232 : vector<8x128xbf16>
    %cst_63 = arith.constant 0.000000e+00 : bf16
    %234 = vector.broadcast %cst_63 : bf16 to vector<8x128xbf16>
    %235 = arith.maximumf %233, %234 : vector<8x128xbf16>
    %c0_64 = arith.constant 0 : index
    %c1536 = arith.constant 1536 : index
    %236 = vector.load %arg11[%c0_64, %c1536] : memref<8x2048xbf16, #tpu.memory_space<vmem>>, vector<8x128xbf16>
    tpu.vector_store %arg11[%c0_64, %c1536], %235 {strides = array<i32>} : memref<8x2048xbf16, #tpu.memory_space<vmem>>, vector<8x128xbf16>,
    %c16_i32_65 = arith.constant 16 : i32
    %237 = arith.muli %arg1, %c16_i32_65 : i32
    %c13_i32 = arith.constant 13 : i32
    %238 = arith.addi %237, %c13_i32 : i32
    %239 = arith.index_cast %238 : i32 to index
    %240 = memref.load %arg2[%239] : memref<16xf32, #tpu.memory_space<smem>>
    %241 = vector.broadcast %240 : f32 to vector<1x128xf32>
    %242 = arith.truncf %241 : vector<1x128xf32> to vector<1x128xbf16>
    %243 = arith.index_cast %238 : i32 to index
    %244 = memref.load %arg3[%243] : memref<16xf32, #tpu.memory_space<smem>>
    %245 = vector.broadcast %244 : f32 to vector<1x128xf32>
    %246 = arith.truncf %245 : vector<1x128xf32> to vector<1x128xbf16>
    %c0_66 = arith.constant 0 : index
    %c0_67 = arith.constant 0 : index
    %247 = vector.load %arg4[%c0_66, %c0_67] : memref<8x128xbf16, #tpu.memory_space<vmem>>, vector<8x128xbf16>
    %248 = vector.broadcast %242 : vector<1x128xbf16> to vector<8x128xbf16>
    %249 = arith.mulf %247, %248 : vector<8x128xbf16>
    %250 = vector.broadcast %246 : vector<1x128xbf16> to vector<8x128xbf16>
    %251 = arith.addf %249, %250 : vector<8x128xbf16>
    %cst_68 = arith.constant 0.000000e+00 : bf16
    %252 = vector.broadcast %cst_68 : bf16 to vector<8x128xbf16>
    %253 = arith.maximumf %251, %252 : vector<8x128xbf16>
    %c0_69 = arith.constant 0 : index
    %c1664 = arith.constant 1664 : index
    %254 = vector.load %arg11[%c0_69, %c1664] : memref<8x2048xbf16, #tpu.memory_space<vmem>>, vector<8x128xbf16>
    tpu.vector_store %arg11[%c0_69, %c1664], %253 {strides = array<i32>} : memref<8x2048xbf16, #tpu.memory_space<vmem>>, vector<8x128xbf16>,
    %c16_i32_70 = arith.constant 16 : i32
    %255 = arith.muli %arg1, %c16_i32_70 : i32
    %c14_i32 = arith.constant 14 : i32
    %256 = arith.addi %255, %c14_i32 : i32
    %257 = arith.index_cast %256 : i32 to index
    %258 = memref.load %arg2[%257] : memref<16xf32, #tpu.memory_space<smem>>
    %259 = vector.broadcast %258 : f32 to vector<1x128xf32>
    %260 = arith.truncf %259 : vector<1x128xf32> to vector<1x128xbf16>
    %261 = arith.index_cast %256 : i32 to index
    %262 = memref.load %arg3[%261] : memref<16xf32, #tpu.memory_space<smem>>
    %263 = vector.broadcast %262 : f32 to vector<1x128xf32>
    %264 = arith.truncf %263 : vector<1x128xf32> to vector<1x128xbf16>
    %c0_71 = arith.constant 0 : index
    %c0_72 = arith.constant 0 : index
    %265 = vector.load %arg4[%c0_71, %c0_72] : memref<8x128xbf16, #tpu.memory_space<vmem>>, vector<8x128xbf16>
    %266 = vector.broadcast %260 : vector<1x128xbf16> to vector<8x128xbf16>
    %267 = arith.mulf %265, %266 : vector<8x128xbf16>
    %268 = vector.broadcast %264 : vector<1x128xbf16> to vector<8x128xbf16>
    %269 = arith.addf %267, %268 : vector<8x128xbf16>
    %cst_73 = arith.constant 0.000000e+00 : bf16
    %270 = vector.broadcast %cst_73 : bf16 to vector<8x128xbf16>
    %271 = arith.maximumf %269, %270 : vector<8x128xbf16>
    %c0_74 = arith.constant 0 : index
    %c1792 = arith.constant 1792 : index
    %272 = vector.load %arg11[%c0_74, %c1792] : memref<8x2048xbf16, #tpu.memory_space<vmem>>, vector<8x128xbf16>
    tpu.vector_store %arg11[%c0_74, %c1792], %271 {strides = array<i32>} : memref<8x2048xbf16, #tpu.memory_space<vmem>>, vector<8x128xbf16>,
    %c16_i32_75 = arith.constant 16 : i32
    %273 = arith.muli %arg1, %c16_i32_75 : i32
    %c15_i32 = arith.constant 15 : i32
    %274 = arith.addi %273, %c15_i32 : i32
    %275 = arith.index_cast %274 : i32 to index
    %276 = memref.load %arg2[%275] : memref<16xf32, #tpu.memory_space<smem>>
    %277 = vector.broadcast %276 : f32 to vector<1x128xf32>
    %278 = arith.truncf %277 : vector<1x128xf32> to vector<1x128xbf16>
    %279 = arith.index_cast %274 : i32 to index
    %280 = memref.load %arg3[%279] : memref<16xf32, #tpu.memory_space<smem>>
    %281 = vector.broadcast %280 : f32 to vector<1x128xf32>
    %282 = arith.truncf %281 : vector<1x128xf32> to vector<1x128xbf16>
    %c0_76 = arith.constant 0 : index
    %c0_77 = arith.constant 0 : index
    %283 = vector.load %arg4[%c0_76, %c0_77] : memref<8x128xbf16, #tpu.memory_space<vmem>>, vector<8x128xbf16>
    %284 = vector.broadcast %278 : vector<1x128xbf16> to vector<8x128xbf16>
    %285 = arith.mulf %283, %284 : vector<8x128xbf16>
    %286 = vector.broadcast %282 : vector<1x128xbf16> to vector<8x128xbf16>
    %287 = arith.addf %285, %286 : vector<8x128xbf16>
    %cst_78 = arith.constant 0.000000e+00 : bf16
    %288 = vector.broadcast %cst_78 : bf16 to vector<8x128xbf16>
    %289 = arith.maximumf %287, %288 : vector<8x128xbf16>
    %c0_79 = arith.constant 0 : index
    %c1920 = arith.constant 1920 : index
    %290 = vector.load %arg11[%c0_79, %c1920] : memref<8x2048xbf16, #tpu.memory_space<vmem>>, vector<8x128xbf16>
    tpu.vector_store %arg11[%c0_79, %c1920], %289 {strides = array<i32>} : memref<8x2048xbf16, #tpu.memory_space<vmem>>, vector<8x128xbf16>,
    %c0_80 = arith.constant 0 : index
    %c0_81 = arith.constant 0 : index
    %291 = vector.load %arg10[%c0_80, %c0_81] : memref<8x32xf32, #tpu.memory_space<vmem>>, vector<8x32xf32>
    %c0_82 = arith.constant 0 : index
    %c0_83 = arith.constant 0 : index
    %292 = vector.load %arg11[%c0_82, %c0_83] : memref<8x2048xbf16, #tpu.memory_space<vmem>>, vector<8x2048xbf16>
    %c0_84 = arith.constant 0 : index
    %c0_85 = arith.constant 0 : index
    %293 = vector.load %arg5[%c0_84, %c0_85] : memref<2048x32xbf16, #tpu.memory_space<vmem>>, vector<2048x32xbf16>
    %cst_86 = arith.constant dense<0.000000e+00> : vector<8x32xf32>
    %294 = tpu.matmul %292, %293, %cst_86 {dimension_numbers = #tpu.dot_dimension_numbers<[1], [0], [0], [1], [0, 0, 1, 1], [], []>} : vector<8x2048xbf16>, vector<2048x32xbf16>, vector<8x32xf32> -> vector<8x32xf32>
    %295 = arith.addf %291, %294 : vector<8x32xf32>
    %c0_87 = arith.constant 0 : index
    %c0_88 = arith.constant 0 : index
    %296 = vector.load %arg10[%c0_87, %c0_88] : memref<8x32xf32, #tpu.memory_space<vmem>>, vector<8x32xf32>
    tpu.vector_store %arg10[%c0_87, %c0_88], %295 {strides = array<i32>} : memref<8x32xf32, #tpu.memory_space<vmem>>, vector<8x32xf32>,
    %c0_i32_89 = arith.constant 0 : i32
    %297 = arith.cmpi eq, %arg1, %c0_i32_89 : i32
    %298 = arith.extui %297 : i1 to i32
    %c0_i32_90 = arith.constant 0 : i32
    %299 = arith.cmpi ne, %298, %c0_i32_90 : i32
    scf.if %299 {
      %c0_91 = arith.constant 0 : index
      %c0_92 = arith.constant 0 : index
      %300 = vector.load %arg10[%c0_91, %c0_92] : memref<8x32xf32, #tpu.memory_space<vmem>>, vector<8x32xf32>
      %c0_93 = arith.constant 0 : index
      %c0_94 = arith.constant 0 : index
      %301 = vector.load %arg6[%c0_93, %c0_94] : memref<1x32xf32, #tpu.memory_space<vmem>>, vector<1x32xf32>
      %302 = vector.broadcast %301 : vector<1x32xf32> to vector<8x32xf32>
      %303 = arith.addf %300, %302 : vector<8x32xf32>
      %cst_95 = arith.constant 0.000000e+00 : f32
      %304 = vector.broadcast %cst_95 : f32 to vector<8x32xf32>
      %305 = arith.maximumf %303, %304 : vector<8x32xf32>
      %c0_96 = arith.constant 0 : index
      %c0_97 = arith.constant 0 : index
      %306 = vector.load %arg7[%c0_96, %c0_97] : memref<1x32xf32, #tpu.memory_space<vmem>>, vector<1x32xf32>
      %307 = tpu.transpose %305, [1, 0] : vector<8x32xf32> -> vector<32x8xf32>
      %cst_98 = arith.constant dense<0.000000e+00> : vector<1x8xf32>
      %308 = tpu.matmul %306, %307, %cst_98 {dimension_numbers = #tpu.dot_dimension_numbers<[1], [0], [0], [1], [0, 0, 1, 1], [], []>} : vector<1x32xf32>, vector<32x8xf32>, vector<1x8xf32> -> vector<1x8xf32>
      %c0_99 = arith.constant 0 : index
      %c0_100 = arith.constant 0 : index
      %309 = vector.load %arg8[%c0_99, %c0_100] : memref<1x1xf32, #tpu.memory_space<vmem>>, vector<1x1xf32>
      %310 = vector.broadcast %309 : vector<1x1xf32> to vector<1x8xf32>
      %311 = arith.addf %308, %310 : vector<1x8xf32>
      %312 = vector.shape_cast %311 : vector<1x8xf32> to vector<1x1x8xf32>
      %c0_101 = arith.constant 0 : index
      %c0_102 = arith.constant 0 : index
      %c0_103 = arith.constant 0 : index
      %313 = vector.load %arg9[%c0_101, %c0_102, %c0_103] : memref<1x1x8xf32, #tpu.memory_space<vmem>>, vector<1x1x8xf32>
      tpu.vector_store %arg9[%c0_101, %c0_102, %c0_103], %312 {strides = array<i32>} : memref<1x1x8xf32, #tpu.memory_space<vmem>>, vector<1x1x8xf32>,
    } else {
    }
    return
  }
  func.func @transform_0(%arg0: i32, %arg1: i32) -> i32 {
    %c0_i32 = arith.constant 0 : i32
    %c0_i32_0 = arith.constant 0 : i32
    return %c0_i32 : i32
  }
  func.func @transform_1(%arg0: i32, %arg1: i32) -> i32 {
    %c0_i32 = arith.constant 0 : i32
    %c0_i32_0 = arith.constant 0 : i32
    return %c0_i32 : i32
  }
  func.func @transform_2(%arg0: i32, %arg1: i32) -> (i32, i32) {
    %c0_i32 = arith.constant 0 : i32
    %c0_i32_0 = arith.constant 0 : i32
    return %arg0, %c0_i32 : i32, i32
  }
  func.func @transform_3(%arg0: i32, %arg1: i32) -> (i32, i32) {
    %c0_i32 = arith.constant 0 : i32
    %c0_i32_0 = arith.constant 0 : i32
    return %arg1, %c0_i32 : i32, i32
  }
  func.func @transform_4(%arg0: i32, %arg1: i32) -> (i32, i32) {
    %c0_i32 = arith.constant 0 : i32
    %c0_i32_0 = arith.constant 0 : i32
    %c0_i32_1 = arith.constant 0 : i32
    return %c0_i32, %c0_i32_0 : i32, i32
  }
  func.func @transform_5(%arg0: i32, %arg1: i32) -> (i32, i32) {
    %c0_i32 = arith.constant 0 : i32
    %c0_i32_0 = arith.constant 0 : i32
    %c0_i32_1 = arith.constant 0 : i32
    return %c0_i32, %c0_i32_0 : i32, i32
  }
  func.func @transform_6(%arg0: i32, %arg1: i32) -> (i32, i32) {
    %c0_i32 = arith.constant 0 : i32
    %c0_i32_0 = arith.constant 0 : i32
    %c0_i32_1 = arith.constant 0 : i32
    return %c0_i32, %c0_i32_0 : i32, i32
  }
  func.func @transform_7(%arg0: i32, %arg1: i32) -> (i32, i32, i32) {
    %c0_i32 = arith.constant 0 : i32
    %c0_i32_0 = arith.constant 0 : i32
    %c0_i32_1 = arith.constant 0 : i32
    return %arg0, %c0_i32, %c0_i32_0 : i32, i32, i32
  }
}

</mosaic_0001>

<bundles_post_ra>
// kernel: tpu_custom_call.1
= control target key start
LH: loop header
LB: loop body
LE: loop exit
PB: predicated region body
PF: predicated region fallthrough
CT: control target
= control target key end

     0   :  { %s2668_s0 = inlined_call_operand.hbm [shape: f32[16], index: 0, kind: input, shape index: {}]   ;;  %s2669_s1 = inlined_call_operand.hbm [shape: f32[16], index: 1, kind: input, shape index: {}]   ;;  %s2670_s2 = inlined_call_operand.hbm [shape: bf16[8,128], index: 2, kind: input, shape index: {}]   ;;  %s2671_s3 = inlined_call_operand.hbm [shape: bf16[2048,32], index: 3, kind: input, shape index: {}]   ;;  %s2672_s4 = inlined_call_operand.hbm [shape: f32[1,32], index: 4, kind: input, shape index: {}]   ;;  %s2673_s5 = inlined_call_operand.hbm [shape: f32[1,32], index: 5, kind: input, shape index: {}]   ;;  %s2674_s6 = inlined_call_operand.<no memory space> [shape: f32[1,1], index: 6, kind: input, shape index: {}]   ;;  %s2675_s7 = inlined_call_operand.hbm [shape: f32[1,1,8], index: 7, kind: output, shape index: {}]  }
   0x1   :  { %v12_v0 = vstv %s2674_s6 }
   0x2   :  { %13 = vst [vmem:[#allocation4] sm:$0x1] %v12_v0 }
   0x3   :  { %14 = vsyncpa [#allocation8], 0 }
   0x4   :  { %15 = vsyncpa [#allocation10], 0 }
   0x5   :  { %16 = vsyncpa [#allocation6], 0 }
   0x6   :  { %17 = vsyncpa [#allocation13], 0 }
   0x7   :  { %18 = vsyncpa [#allocation16], 0 }
   0x8   :  { %19 = vsyncpa [#allocation7], 0  ;;  %s2490_s26 = smov [#allocation12]   ;;  %s2348_s30 = scalar_lea.hbm %s2671_s3, 16384 }
   0x9   :  { %s51_s27 = sshll.u32 %s2490_s26, 4  ;;  %p2349_p0 = scmp.ne.s32.totalorder %s2671_s3, %s2348_s30  ;;  %s52_s27 = int_to_ptr.vmem [resolvable:$true] %s51_s27 }
   0xa   :  { %p2352_p1 = scmp.lt.u32.totalorder %s2348_s30, %s2671_s3 }
   0xc   :  { %p2354_p2 = pnand %p2352_p1, %p2349_p0 }
   0xe   :  { %2357 = shalt.err (!%p2354_p2)
}
   0xf   :  { %s2358_s11 = scalar_lea.vmem %s52_s27, 16384  ;;  %p2363_p4 = scmp.lt.s32.totalorder %s52_s27, %s52_s27 }
  0x10   :  { %p2359_p3 = scmp.ne.s32.totalorder %s52_s27, %s2358_s11  ;;  %p2364_p5 = scmp.lt.s32.totalorder %s2358_s11, %s2358_s11 }
  0x12   :  { %p2365_p6 = por %p2364_p5, %p2363_p4 }
  0x14   :  { %p2366_p7 = pnand %p2365_p6, %p2359_p3 }
  0x16   :  { %2369 = shalt.err (!%p2366_p7)
}
  0x17   :  { %s2491_s12 = smov 64   ;;  %s2492_s13 = smov 4  }
  0x18   :  { %57 = dma.hbm_to_vmem [thread:$0]  %s2671_s3, 16384, %s52_s27, [#allocation13], %s2491_s12, %s2491_s12, %s2492_s13  }
  0x19   :  { %s2370_s18 = scalar_lea.hbm %s2668_s0, 16 }
  0x1a   :  { %p2371_p8 = scmp.ne.s32.totalorder %s2668_s0, %s2370_s18  ;;  %p2374_p9 = scmp.lt.u32.totalorder %s2370_s18, %s2668_s0 }
  0x1c   :  { %p2376_p10 = pnand %p2374_p9, %p2371_p8 }
  0x1e   :  { %2379 = shalt.err (!%p2376_p10)
}
  0x1f   :  { %s2493_s23 = smov [#allocation5]   ;;  %s2380_s27 = scalar_lea.hbm %s2669_s1, 16 }
  0x20   :  { %27 = dma.hbm_to_smem %s2668_s0, 16, %s2493_s23, [#allocation8]  }
  0x21   :  { %p2381_p11 = scmp.ne.s32.totalorder %s2669_s1, %s2380_s27  ;;  %p2384_p12 = scmp.lt.u32.totalorder %s2380_s27, %s2669_s1 }
  0x23   :  { %p2386_p13 = pnand %p2384_p12, %p2381_p11 }
  0x25   :  { %2389 = shalt.err (!%p2386_p13)
}
  0x26   :  { %s2494_s9 = smov [#allocation9]   ;;  %s2495_s0 = smov [#allocation11]  }
  0x27   :  { %35 = dma.hbm_to_smem %s2669_s1, 16, %s2494_s9, [#allocation10]  }
  0x28   :  { %s42_s11 = sshll.u32 %s2495_s0, 4  ;;  %s2496_s12 = smov [#allocation14]   ;;  %s43_s11 = int_to_ptr.vmem [resolvable:$true] %s42_s11 }
  0x29   :  { %s64_s13 = sshll.u32 %s2496_s12, 4  ;;  %s2390_s16 = scalar_lea.hbm %s2670_s2, 64  ;;  %s65_s13 = int_to_ptr.vmem [resolvable:$true] %s64_s13 }
  0x2a   :  { %p2391_p0 = scmp.ne.s32.totalorder %s2670_s2, %s2390_s16  ;;  %p2394_p1 = scmp.lt.u32.totalorder %s2390_s16, %s2670_s2 }
  0x2c   :  { %p2396_p2 = pnand %p2394_p1, %p2391_p0 }
  0x2e   :  { %2399 = shalt.err (!%p2396_p2)
}
  0x2f   :  { %s2400_s1 = scalar_lea.vmem %s43_s11, 64  ;;  %p2405_p4 = scmp.lt.s32.totalorder %s43_s11, %s43_s11 }
  0x30   :  { %p2401_p3 = scmp.ne.s32.totalorder %s43_s11, %s2400_s1  ;;  %p2406_p5 = scmp.lt.s32.totalorder %s2400_s1, %s2400_s1 }
  0x32   :  { %p2407_p6 = por %p2406_p5, %p2405_p4 }
  0x34   :  { %p2408_p7 = pnand %p2407_p6, %p2401_p3 }
  0x36   :  { %2411 = shalt.err (!%p2408_p7)
}
  0x37   :  { %45 = dma.hbm_to_vmem [thread:$0]  %s2670_s2, 64, %s43_s11, [#allocation6]  }
  0x38   :  { %s2412_s25 = scalar_lea.hbm %s2672_s4, 16 }
  0x39   :  { %p2413_p8 = scmp.ne.s32.totalorder %s2672_s4, %s2412_s25  ;;  %p2416_p9 = scmp.lt.u32.totalorder %s2412_s25, %s2672_s4 }
  0x3b   :  { %p2418_p10 = pnand %p2416_p9, %p2413_p8 }
  0x3d   :  { %2421 = shalt.err (!%p2418_p10)
}
  0x3e   :  { %s2422_s29 = scalar_lea.vmem %s65_s13, 16  ;;  %s2426_s30 = scalar_lea.vmem %s65_s13, 32 }
  0x3f   :  { %p2423_p11 = scmp.ne.s32.totalorder %s65_s13, %s2422_s29  ;;  %p2427_p12 = scmp.lt.s32.totalorder %s65_s13, %s65_s13 }
  0x40   :  { %p2428_p13 = scmp.lt.s32.totalorder %s2426_s30, %s2422_s29 }
  0x42   :  { %p2429_p0 = por %p2428_p13, %p2427_p12 }
  0x44   :  { %p2430_p1 = pnand %p2429_p0, %p2423_p11 }
  0x46   :  { %2433 = shalt.err (!%p2430_p1)
}
  0x47   :  { %67 = dma.hbm_to_vmem [thread:$0]  %s2672_s4, 16, %s65_s13, [#allocation13]  }
  0x48   :  { %s2497_s9 = smov [#allocation15]   ;;  %s2434_s11 = scalar_lea.hbm %s2673_s5, 16 }
  0x49   :  { %s74_s10 = sshll.u32 %s2497_s9, 4  ;;  %p2435_p2 = scmp.ne.s32.totalorder %s2673_s5, %s2434_s11  ;;  %s75_s10 = int_to_ptr.vmem [resolvable:$true] %s74_s10 }
  0x4a   :  { %p2438_p3 = scmp.lt.u32.totalorder %s2434_s11, %s2673_s5 }
  0x4c   :  { %p2440_p4 = pnand %p2438_p3, %p2435_p2 }
  0x4e   :  { %2443 = shalt.err (!%p2440_p4)
}
  0x4f   :  { %s2444_s17 = scalar_lea.vmem %s75_s10, 16  ;;  %s2448_s4 = scalar_lea.vmem %s75_s10, 32 }
  0x50   :  { %p2445_p5 = scmp.ne.s32.totalorder %s75_s10, %s2444_s17  ;;  %p2449_p6 = scmp.lt.s32.totalorder %s75_s10, %s75_s10 }
  0x51   :  { %p2450_p7 = scmp.lt.s32.totalorder %s2448_s4, %s2444_s17 }
  0x53   :  { %p2451_p8 = por %p2450_p7, %p2449_p6 }
  0x55   :  { %p2452_p9 = pnand %p2451_p8, %p2445_p5 }
  0x57   :  { %2455 = shalt.err (!%p2452_p9)
}
  0x58   :  { %77 = dma.hbm_to_vmem [thread:$0]  %s2673_s5, 16, %s75_s10, [#allocation16]  }
  0x59   :  { %2478 = dma.done.wait [#allocation8], 16  }
  0x5a   :  { %2479 = vsyncadd [#allocation8], 4294967280 }
  0x5b   :  { %2480 = dma.done.wait [#allocation10], 16  }
  0x5c   :  { %2481 = vsyncadd [#allocation10], 4294967280 }
  0x5d   :  { %2482 = dma.done.wait [#allocation6], 64  }
  0x5e   :  { %2483 = vsyncadd [#allocation6], 4294967232 }
  0x5f   :  { %2484 = dma.done.wait [#allocation13], 16400  }
  0x60   :  { %2485 = vsyncadd [#allocation13], 4294950896 }
  0x61   :  { %2486 = dma.done.wait [#allocation16], 16  }
  0x62   :  { %2487 = vsyncadd [#allocation16], 4294967280 }
  0x63   :  { %98 = sfence }
  0x64   :  { %v2204_v1 = vld [vmem:[#allocation12 + $0x40] sm:$0xff]   ;;  %v2498_v3 = vmov 0   ;;  %v2208_v6 = vld [vmem:[#allocation12 + $0x48] sm:$0xff]   ;;  %v2212_v10 = vld [vmem:[#allocation12 + $0x50] sm:$0xff]   ;;  %s107_s5 = sld [smem:[#allocation5]]  ;;  %s1831_s20 = sld [smem:[#allocation5 + $0x1]] }
  0x65   :  { %v2205_v2 = vld [vmem:[#allocation12 + $0xc0] sm:$0xff]   ;;  %2203 = vset.pattern.permute.xlu0 %v2498_v3  ;;  %2008 = vmatprep.subr.bf16.mxu0 %v2204_v1  ;;  %v2209_v7 = vld [vmem:[#allocation12 + $0xc8] sm:$0xff]   ;;  %v2213_v11 = vld [vmem:[#allocation12 + $0xd0] sm:$0xff]   ;;  %s110_s19 = sld [smem:[#allocation9]]  ;;  %s1832_s1 = sld [smem:[#allocation9 + $0x1]]  ;;  %vm104_vm0 = vcmask 261120  }
  0x66   :  { %v2206_v4 = vld [vmem:[#allocation12] sm:$0xff]   ;;  %2030 = vmatprep.subr.bf16.mxu1 %v2205_v2  ;;  %v2210_v8 = vld [vmem:[#allocation12 + $0x8] sm:$0xff]   ;;  %v2214_v12 = vld [vmem:[#allocation12 + $0x10] sm:$0xff]   ;;  %s1833_s21 = sld [smem:[#allocation5 + $0x2]]  ;;  %s1835_s23 = sld [smem:[#allocation5 + $0x3]]  ;;  %vm2500_vm1 = vmmov 0  }
  0x67   :  { %v2207_v5 = vld [vmem:[#allocation12 + $0x80] sm:$0xff]   ;;  %2009 = vmatpush3.bf16.msra.mxu0 %v2206_v4  ;;  %v2211_v9 = vld [vmem:[#allocation12 + $0x88] sm:$0xff]   ;;  %v2215_v13 = vld [vmem:[#allocation12 + $0x90] sm:$0xff]   ;;  %s1834_s22 = sld [smem:[#allocation9 + $0x2]]  ;;  %s1836_s24 = sld [smem:[#allocation9 + $0x3]]  ;;  %vm1810_vm2 = vcmask 57344  }
  0x68   :  { %2031 = vmatpush3.bf16.msra.mxu1 %v2207_v5  ;;  %2010 = vmatprep.subr.bf16.mxu0 %v2208_v6  ;;  %v2216_v14 = vld [vmem:[#allocation12 + $0x58] sm:$0xff]   ;;  %v2220_v18 = vld [vmem:[#allocation12 + $0x60] sm:$0xff]   ;;  %v2224_v22 = vld [vmem:[#allocation12 + $0x68] sm:$0xff]   ;;  %s1837_s25 = sld [smem:[#allocation5 + $0x4]]  ;;  %s1839_s26 = sld [smem:[#allocation5 + $0x5]] }
  0x69   :  { %2032 = vmatprep.subr.bf16.mxu1 %v2209_v7  ;;  %v2217_v15 = vld [vmem:[#allocation12 + $0xd8] sm:$0xff]   ;;  %v2221_v19 = vld [vmem:[#allocation12 + $0xe0] sm:$0xff]   ;;  %v2225_v23 = vld [vmem:[#allocation12 + $0xe8] sm:$0xff]   ;;  %s1838_s3 = sld [smem:[#allocation9 + $0x4]]  ;;  %s1840_s27 = sld [smem:[#allocation9 + $0x5]] }
  0x6a   :  { %v2218_v16 = vld [vmem:[#allocation12 + $0x18] sm:$0xff]   ;;  %v2222_v20 = vld [vmem:[#allocation12 + $0x20] sm:$0xff]   ;;  %v2226_v24 = vld [vmem:[#allocation12 + $0x28] sm:$0xff]   ;;  %v108_v36 = vstv %s107_s5  ;;  %v120_v41 = vstv %s1831_s20  ;;  %s1841_s28 = sld [smem:[#allocation5 + $0x6]]  ;;  %s2622_s30 = sld [smem:[#allocation5 + $0x7]] }
  0x6b   :  { %2011 = vmatpush3.bf16.msra.mxu0 %v2210_v8  ;;  %v2219_v17 = vld [vmem:[#allocation12 + $0x98] sm:$0xff]   ;;  %v2223_v21 = vld [vmem:[#allocation12 + $0xa0] sm:$0xff]   ;;  %v2227_v25 = vld [vmem:[#allocation12 + $0xa8] sm:$0xff]   ;;  %v111_v37 = vstv %s110_s19  ;;  %v109_v39 = vpack.c.bf16 %v108_v36, %v108_v36  ;;  %v123_v42 = vstv %s1832_s1  ;;  %v121_v44 = vpack.c.bf16 %v120_v41, %v120_v41  ;;  %s1842_s29 = sld [smem:[#allocation9 + $0x6]]  ;;  %s2624_s2 = sld [smem:[#allocation9 + $0x7]] }
  0x6c   :  { %2033 = vmatpush3.bf16.msra.mxu1 %v2211_v9  ;;  %2012 = vmatprep.subr.bf16.mxu0 %v2212_v10  ;;  %v2228_v26 = vld [vmem:[#allocation12 + $0x70] sm:$0xff]   ;;  %v2232_v30 = vld [vmem:[#allocation12 + $0x78] sm:$0xff]   ;;  %v2240_v34 = vld [vmem:[#allocation12 + $0x140] sm:$0xff]   ;;  %v112_v40 = vpack.c.bf16 %v111_v37, %v111_v37  ;;  %v124_v45 = vpack.c.bf16 %v123_v42, %v123_v42  ;;  %v132_v46 = vstv %s1833_s21  ;;  %v144_v52 = vstv %s1835_s23  ;;  %s1845_s8 = sld [smem:[#allocation5 + $0x8]]  ;;  %s1847_s10 = sld [smem:[#allocation5 + $0x9]] }
  0x6d   :  { %2034 = vmatprep.subr.bf16.mxu1 %v2213_v11  ;;  %v2229_v27 = vld [vmem:[#allocation12 + $0xf0] sm:$0xff]   ;;  %v2233_v31 = vld [vmem:[#allocation12 + $0xf8] sm:$0xff]   ;;  %v2241_v35 = vld [vmem:[#allocation12 + $0x1c0] sm:$0xff]   ;;  %v135_v47 = vstv %s1834_s22  ;;  %v133_v50 = vpack.c.bf16 %v132_v46, %v132_v46  ;;  %v145_v55 = vpack.c.bf16 %v144_v52, %v144_v52  ;;  %v147_v56 = vstv %s1836_s24  ;;  %s1846_s9 = sld [smem:[#allocation9 + $0x8]]  ;;  %s1848_s6 = sld [smem:[#allocation9 + $0x9]] }
  0x6e   :  { %v2230_v28 = vld [vmem:[#allocation12 + $0x30] sm:$0xff]   ;;  %v2234_v32 = vld [vmem:[#allocation12 + $0x38] sm:$0xff]   ;;  %v136_v51 = vpack.c.bf16 %v135_v47, %v135_v47  ;;  %v148_v59 = vpack.c.bf16 %v147_v56, %v147_v56  ;;  %v2242_v5 = vld [vmem:[#allocation12 + $0x100] sm:$0xff]   ;;  %s1849_s0 = sld [smem:[#allocation5 + $0xa]]  ;;  %s2632_s12 = sld [smem:[#allocation5 + $0xb]] }
  0x6f   :  { %2013 = vmatpush3.bf16.msra.mxu0 %v2214_v12  ;;  %v2231_v29 = vld [vmem:[#allocation12 + $0xb0] sm:$0xff]   ;;  %v2235_v33 = vld [vmem:[#allocation12 + $0xb8] sm:$0xff]   ;;  %v2243_v9 = vld [vmem:[#allocation12 + $0x180] sm:$0xff]   ;;  %v159_v36 = vstv %s1838_s3  ;;  %s1850_s11 = sld [smem:[#allocation9 + $0xa]]  ;;  %s2634_s14 = sld [smem:[#allocation9 + $0xb]] }
  0x70   :  { %2035 = vmatpush3.bf16.msra.mxu1 %v2215_v13  ;;  %2014 = vmatprep.subr.bf16.mxu0 %v2216_v14  ;;  %v113_v38 = vld [vmem:[#allocation11] sm:$0xf]  ;;  %v2244_v11 = vld [vmem:[#allocation12 + $0x148] sm:$0xff]   ;;  %v2264_v37 = vld [vmem:[#allocation12 + $0x170] sm:$0xff]   ;;  %s1853_s15 = sld [smem:[#allocation5 + $0xc]]  ;;  %s1855_s17 = sld [smem:[#allocation5 + $0xd]] }
  0x71   :  { %2036 = vmatprep.subr.bf16.mxu1 %v2217_v15  ;;  %v125_v43 = vld [vmem:[#allocation11] sm:$0xf]  ;;  %v114_v49 = vmul.bf16 %v113_v38, %v109_v39  ;;  %v2245_v14 = vld [vmem:[#allocation12 + $0x1c8] sm:$0xff]   ;;  %v160_v38 = vpack.c.bf16 %v159_v36, %v159_v36  ;;  %v168_v39 = vstv %s1839_s26  ;;  %v2265_v56 = vld [vmem:[#allocation12 + $0x1f0] sm:$0xff]   ;;  %s1854_s16 = sld [smem:[#allocation9 + $0xc]]  ;;  %s1856_s4 = sld [smem:[#allocation9 + $0xd]] }
  0x72   :  { %v137_v48 = vld [vmem:[#allocation11] sm:$0xf]  ;;  %v126_v54 = vmul.bf16 %v125_v43, %v121_v44  ;;  %v2246_v15 = vld [vmem:[#allocation12 + $0x108] sm:$0xff]   ;;  %v169_v42 = vpack.c.bf16 %v168_v39, %v168_v39  ;;  %v180_v44 = vstv %s1841_s28  ;;  %v2293_v36 = vld [vmem:[#allocation12 + $0x2e0] sm:$0xff]   ;;  %s1857_s13 = sld [smem:[#allocation5 + $0xe]]  ;;  %s2642_s5 = sld [smem:[#allocation5 + $0xf]] }
  0x73   :  { %2015 = vmatpush3.bf16.msra.mxu0 %v2218_v16  ;;  %v149_v53 = vld [vmem:[#allocation11] sm:$0xf]  ;;  %v115_v57 = vadd.bf16 %v114_v49, %v112_v40  ;;  %v138_v58 = vmul.bf16 %v137_v48, %v133_v50  ;;  %v2248_v16 = vld [vmem:[#allocation12 + $0x150] sm:$0xff]   ;;  %v171_v40 = vstv %s1840_s27  ;;  %v181_v48 = vpack.c.bf16 %v180_v44, %v180_v44  ;;  %v2263_v52 = vld [vmem:[#allocation12 + $0x1a8] sm:$0xff]   ;;  %s1858_s18 = sld [smem:[#allocation9 + $0xe]]  ;;  %s2644_s19 = sld [smem:[#allocation9 + $0xf]] }
  0x74   :  { %2037 = vmatpush3.bf16.msra.mxu1 %v2219_v17  ;;  %2016 = vmatprep.subr.bf16.mxu0 %v2220_v18  ;;  %v127_v60 = vadd.bf16 %v126_v54, %v124_v45  ;;  %v150_v61 = vmul.bf16 %v149_v53, %v145_v55  ;;  %v2247_v17 = vld [vmem:[#allocation12 + $0x188] sm:$0xff]   ;;  %v2249_v18 = vld [vmem:[#allocation12 + $0x1d0] sm:$0xff]   ;;  %v173_v41 = vld [vmem:[#allocation11] sm:$0xf]  ;;  %v172_v43 = vpack.c.bf16 %v171_v40, %v171_v40  ;;  %v183_v45 = vstv %s1842_s29  ;;  %s2501_s20 = smov [#allocation17]  }
  0x75   :  { %2038 = vmatprep.subr.bf16.mxu1 %v2221_v19  ;;  %v116_v62 = vmax.bf16 %v2498_v3, %v115_v57  ;;  %v139_v63 = vadd.bf16 %v138_v58, %v136_v51  ;;  %v2250_v19 = vld [vmem:[#allocation12 + $0x110] sm:$0xff]   ;;  %v185_v46 = vld [vmem:[#allocation11] sm:$0xf]  ;;  %v184_v49 = vpack.c.bf16 %v183_v45, %v183_v45  ;;  %v192_v50 = vstv %s2622_s30  ;;  %v2296_v39 = vld [vmem:[#allocation12 + $0x268] sm:$0xff]   ;;  %s1818_s1 = sshll.u32 %s2501_s20, 4  ;;  %s1819_s1 = int_to_ptr.vmem [resolvable:$true] %s1818_s1 }
  0x76   :  { %v128_v0 = vmax.bf16 %v2498_v3, %v127_v60  ;;  %v151_v1 = vadd.bf16 %v150_v61, %v148_v59  ;;  %v197_v51 = vld [vmem:[#allocation11] sm:$0xf]  ;;  %v174_v53 = vmul.bf16 %v173_v41, %v169_v42  ;;  %v193_v54 = vpack.c.bf16 %v192_v50, %v192_v50  ;;  %v2266_v60 = vld [vmem:[#allocation12 + $0x130] sm:$0xff]   ;;  %v2297_v40 = vld [vmem:[#allocation12 + $0x2e8] sm:$0xff]   ;;  %s2456_s21 = scalar_lea.vmem %s1819_s1, 16  ;;  %s2460_s22 = scalar_lea.vmem %s1819_s1, 32 }
  0x77   :  { %2017 = vmatpush3.bf16.msra.mxu0 %v2222_v20  ;;  %117 = vst [vmem:[#allocation3] sm:$0xf] %v116_v62  ;;  %v140_v2 = vmax.bf16 %v2498_v3, %v139_v63  ;;  %v2252_v20 = vld [vmem:[#allocation12 + $0x158] sm:$0xff]   ;;  %v195_v55 = vstv %s2624_s2  ;;  %v186_v58 = vmul.bf16 %v185_v46, %v181_v48  ;;  %v2298_v42 = vld [vmem:[#allocation12 + $0x228] sm:$0xff]   ;;  %v2300_v44 = vld [vmem:[#allocation12 + $0x270] sm:$0xff]   ;;  %v216_v46 = vstv %s1847_s10  ;;  %p2457_p10 = scmp.ne.s32.totalorder %s1819_s1, %s2456_s21  ;;  %p2461_p11 = scmp.lt.s32.totalorder %s1819_s1, %s1819_s1 }
  0x78   :  { %2039 = vmatpush3.bf16.msra.mxu1 %v2223_v21  ;;  %2018 = vmatprep.subr.bf16.mxu0 %v2224_v22  ;;  %129 = vst [vmem:[#allocation3 + $0x4] sm:$0xf] %v128_v0  ;;  %v152_v4 = vmax.bf16 %v2498_v3, %v151_v1  ;;  %v2251_v21 = vld [vmem:[#allocation12 + $0x190] sm:$0xff]   ;;  %v156_v22 = vstv %s1837_s25  ;;  %v196_v59 = vpack.c.bf16 %v195_v55, %v195_v55  ;;  %v2268_v63 = vld [vmem:[#allocation12 + $0x178] sm:$0xff]   ;;  %p2462_p12 = scmp.lt.s32.totalorder %s2460_s22, %s2456_s21 }
  0x79   :  { %2040 = vmatprep.subr.bf16.mxu1 %v2225_v23  ;;  %141 = vst [vmem:[#allocation3 + $0x8] sm:$0xf] %v140_v2  ;;  %v2253_v23 = vld [vmem:[#allocation12 + $0x1d8] sm:$0xff]   ;;  %v175_v61 = vadd.bf16 %v174_v53, %v172_v43  ;;  %v198_v62 = vmul.bf16 %v197_v51, %v193_v54  ;;  %v187_v0 = vadd.bf16 %v186_v58, %v184_v49  ;;  %v2267_v1 = vld [vmem:[#allocation12 + $0x1b0] sm:$0xff]   ;;  %v207_v43 = vstv %s1846_s9 }
  0x7a   :  { %153 = vst [vmem:[#allocation3 + $0xc] sm:$0xf] %v152_v4  ;;  %v208_v45 = vpack.c.bf16 %v207_v43, %v207_v43  ;;  %v221_v48 = vld [vmem:[#allocation11] sm:$0xf]  ;;  %v217_v49 = vpack.c.bf16 %v216_v46, %v216_v46  ;;  %v228_v51 = vstv %s1849_s0  ;;  %v2329_v43 = vld [vmem:[#allocation12 + $0x3e0] sm:$0xff]   ;;  %p2463_p13 = por %p2462_p12, %p2461_p11 }
  0x7b   :  { %2019 = vmatpush3.bf16.msra.mxu0 %v2226_v24  ;;  %v2254_v24 = vld [vmem:[#allocation12 + $0x118] sm:$0xff]   ;;  %v176_v2 = vmax.bf16 %v2498_v3, %v175_v61  ;;  %v199_v4 = vadd.bf16 %v198_v62, %v196_v59  ;;  %v229_v55 = vpack.c.bf16 %v228_v51, %v228_v51  ;;  %v2299_v59 = vld [vmem:[#allocation12 + $0x2a8] sm:$0xff]   ;;  %v243_v62 = vstv %s2634_s14 }
  0x7c   :  { %2041 = vmatpush3.bf16.msra.mxu1 %v2227_v25  ;;  %2020 = vmatprep.subr.bf16.mxu0 %v2228_v26  ;;  %v2255_v25 = vld [vmem:[#allocation12 + $0x198] sm:$0xff]   ;;  %v2256_v26 = vld [vmem:[#allocation12 + $0x160] sm:$0xff]   ;;  %v264_v51 = vstv %s1855_s17  ;;  %p2464_p0 = pnand %p2463_p13, %p2457_p10 }
  0x7d   :  { %2042 = vmatprep.subr.bf16.mxu1 %v2229_v27  ;;  %v157_v27 = vpack.c.bf16 %v156_v22, %v156_v22  ;;  %177 = vst [vmem:[#allocation3 + $0x14] sm:$0xf] %v176_v2  ;;  %v2282_v22 = vld [vmem:[#allocation12 + $0x208] sm:$0xff]   ;;  %v233_v53 = vld [vmem:[#allocation11] sm:$0xf]  ;;  %v244_v2 = vpack.c.bf16 %v243_v62, %v243_v62 }
  0x7e   :  { %v245_v58 = vld [vmem:[#allocation11] sm:$0xf] }
  0x7f   :  { %2021 = vmatpush3.bf16.msra.mxu0 %v2230_v28  ;;  %v299_v6 = vld [vmem:[#allocation3] sm:$0xff] }
  0x80   :  { %2043 = vmatpush3.bf16.msra.mxu1 %v2231_v29  ;;  %2022 = vmatprep.subr.bf16.mxu0 %v2232_v30  ;;  %v1861_v7 = vcombine.low %v299_v6, %v299_v6  ;;  %v1862_v8 = vcombine.high %v299_v6, %v299_v6  ;;  %v161_v28 = vld [vmem:[#allocation11] sm:$0xf]  ;;  %v2257_v29 = vld [vmem:[#allocation12 + $0x1e0] sm:$0xff]   ;;  %v188_v6 = vmax.bf16 %v2498_v3, %v187_v0 }
  0x81   :  { %2044 = vmatprep.subr.bf16.mxu1 %v2233_v31  ;;  %v300_v10 = vld [vmem:[#allocation3 + $0x8] sm:$0xff] }
  0x82   :  { %1419 = vmatprep.mubr.bf16.mxu0 %v1862_v8  ;;  %v1863_v12 = vcombine.low %v300_v10, %v300_v10  ;;  %v1864_v13 = vcombine.high %v300_v10, %v300_v10  ;;  %v2258_v30 = vld [vmem:[#allocation12 + $0x120] sm:$0xff]   ;;  %v200_v8 = vmax.bf16 %v2498_v3, %v199_v4  ;;  %189 = vst [vmem:[#allocation3 + $0x18] sm:$0xf] %v188_v6  ;;  %v2271_v10 = vld [vmem:[#allocation12 + $0x1b8] sm:$0xff]   ;;  %v2302_v4 = vld [vmem:[#allocation12 + $0x230] sm:$0xff]  }
  0x83   :  { %2023 = vmatpush3.bf16.msra.mxu0 %v2234_v32  ;;  %v2259_v31 = vld [vmem:[#allocation12 + $0x1a0] sm:$0xff]   ;;  %v2260_v32 = vld [vmem:[#allocation12 + $0x168] sm:$0xff]  }
  0x84   :  { %2045 = vmatpush3.bf16.msra.mxu1 %v2235_v33  ;;  %2052 = vmatprep.subr.bf16.mxu0 %v2240_v34  ;;  %v2261_v33 = vld [vmem:[#allocation12 + $0x1e8] sm:$0xff]   ;;  %v162_v34 = vmul.bf16 %v161_v28, %v157_v27  ;;  %201 = vst [vmem:[#allocation3 + $0x1c] sm:$0xf] %v200_v8  ;;  %v2288_v27 = vld [vmem:[#allocation12 + $0x258] sm:$0xff]   ;;  %v2287_v28 = vld [vmem:[#allocation12 + $0x290] sm:$0xff]  }
  0x85   :  { %2074 = vmatprep.subr.bf16.mxu1 %v2241_v35  ;;  %1459 = vmatprep.mubr.bf16.mxu1 %v1864_v13  ;;  %v2262_v35 = vld [vmem:[#allocation12 + $0x128] sm:$0xff]  }
  0x86   :  { %1420 = vmatmul.mubr.bf16.vlgmr.msra.gmra.mrb[0].mxu0 %v1861_v7  ;;  %v163_v47 = vadd.bf16 %v162_v34, %v160_v38  ;;  %v2270_v7 = vld [vmem:[#allocation12 + $0x138] sm:$0xff]   ;;  %v2295_v38 = vld [vmem:[#allocation12 + $0x2a0] sm:$0xff]  }
  0x87   :  { %2053 = vmatpush3.bf16.msra.mxu0 %v2242_v5  ;;  %1460 = vmatmul.mubr.bf16.vlgmr.msra.gmra.mrb[0].mxu1 %v1863_v12  ;;  %v2269_v5 = vld [vmem:[#allocation12 + $0x1f8] sm:$0xff]   ;;  %v2278_v12 = vld [vmem:[#allocation12 + $0x200] sm:$0xff]  }
  0x88   :  { %2054 = vmatprep.subr.bf16.mxu0 %v2244_v11  ;;  %2075 = vmatpush3.bf16.msra.mxu1 %v2243_v9  ;;  %v164_v57 = vmax.bf16 %v2498_v3, %v163_v47  ;;  %v2276_v9 = vld [vmem:[#allocation12 + $0x240] sm:$0xff]   ;;  %v219_v47 = vstv %s1848_s6 }
  0x89   :  { %2076 = vmatprep.subr.bf16.mxu1 %v2245_v14  ;;  %v2277_v11 = vld [vmem:[#allocation12 + $0x2c0] sm:$0xff]   ;;  %v220_v50 = vpack.c.bf16 %v219_v47, %v219_v47 }
  0x8a   :  { %165 = vst [vmem:[#allocation3 + $0x10] sm:$0xf] %v164_v57  ;;  %v240_v57 = vstv %s2632_s12  ;;  %v2331_v47 = vld [vmem:[#allocation12 + $0x3a0] sm:$0xff]  }
  0x8b   :  { %2055 = vmatpush3.bf16.msra.mxu0 %v2246_v15  ;;  %v241_v61 = vpack.c.bf16 %v240_v57, %v240_v57  ;;  %v276_v57 = vstv %s1857_s13 }
  0x8c   :  { %2056 = vmatprep.subr.bf16.mxu0 %v2248_v16  ;;  %2077 = vmatpush3.bf16.msra.mxu1 %v2247_v17  ;;  %v2279_v16 = vld [vmem:[#allocation12 + $0x280] sm:$0xff]   ;;  %v302_v17 = vld [vmem:[#allocation3 + $0x18] sm:$0xff]  ;;  %v277_v62 = vpack.c.bf16 %v276_v57, %v276_v57 }
  0x8d   :  { %2078 = vmatprep.subr.bf16.mxu1 %v2249_v18  ;;  %v2280_v18 = vld [vmem:[#allocation12 + $0x248] sm:$0xff]   ;;  %v246_v6 = vmul.bf16 %v245_v58, %v241_v61  ;;  %v279_v58 = vstv %s1858_s18 }
  0x8f   :  { %2057 = vmatpush3.bf16.msra.mxu0 %v2250_v19  ;;  %v1867_v19 = vcombine.low %v302_v17, %v302_v17 }
  0x90   :  { %2058 = vmatprep.subr.bf16.mxu0 %v2252_v20  ;;  %2079 = vmatpush3.bf16.msra.mxu1 %v2251_v21  ;;  %v1868_v20 = vcombine.high %v302_v17, %v302_v17  ;;  %v2281_v21 = vld [vmem:[#allocation12 + $0x2c8] sm:$0xff]   ;;  %v2307_v17 = vld [vmem:[#allocation12 + $0x2b8] sm:$0xff]  }
  0x91   :  { %2080 = vmatprep.subr.bf16.mxu1 %v2253_v23  ;;  %v301_v13 = vld [vmem:[#allocation3 + $0x10] sm:$0xff] }
  0x92   :  { %v1865_v14 = vcombine.low %v301_v13, %v301_v13  ;;  %v1866_v15 = vcombine.high %v301_v13, %v301_v13  ;;  %1539 = vmatprep.mubr.bf16.mxu1 %v1868_v20  ;;  %v2284_v23 = vld [vmem:[#allocation12 + $0x250] sm:$0xff]  }
  0x93   :  { %2059 = vmatpush3.bf16.msra.mxu0 %v2254_v24  ;;  %v2283_v24 = vld [vmem:[#allocation12 + $0x288] sm:$0xff]  }
  0x94   :  { %2060 = vmatprep.subr.bf16.mxu0 %v2256_v26  ;;  %2081 = vmatpush3.bf16.msra.mxu1 %v2255_v25  ;;  %v2285_v25 = vld [vmem:[#allocation12 + $0x2d0] sm:$0xff]  }
  0x95   :  { %2082 = vmatprep.subr.bf16.mxu1 %v2257_v29  ;;  %1499 = vmatprep.mubr.bf16.mxu0 %v1866_v15  ;;  %v2286_v26 = vld [vmem:[#allocation12 + $0x210] sm:$0xff]   ;;  %v204_v29 = vstv %s1845_s8 }
  0x96   :  { %v205_v34 = vpack.c.bf16 %v204_v29, %v204_v29  ;;  %v2318_v29 = vld [vmem:[#allocation12 + $0x308] sm:$0xff]  }
  0x97   :  { %2061 = vmatpush3.bf16.msra.mxu0 %v2258_v30  ;;  %v2289_v30 = vld [vmem:[#allocation12 + $0x2d8] sm:$0xff]  }
  0x98   :  { %2062 = vmatprep.subr.bf16.mxu0 %v2260_v32  ;;  %2083 = vmatpush3.bf16.msra.mxu1 %v2259_v31  ;;  %v2290_v31 = vld [vmem:[#allocation12 + $0x218] sm:$0xff]  }
  0x99   :  { %2084 = vmatprep.subr.bf16.mxu1 %v2261_v33  ;;  %v2291_v32 = vld [vmem:[#allocation12 + $0x298] sm:$0xff]   ;;  %v2292_v33 = vld [vmem:[#allocation12 + $0x260] sm:$0xff]  }
  0x9b   :  { %2063 = vmatpush3.bf16.msra.mxu0 %v2262_v35  ;;  %v209_v35 = vld [vmem:[#allocation11] sm:$0xf] }
  0x9c   :  { %2064 = vmatprep.subr.bf16.mxu0 %v2264_v37  ;;  %2085 = vmatpush3.bf16.msra.mxu1 %v2263_v52  ;;  %v2294_v37 = vld [vmem:[#allocation12 + $0x220] sm:$0xff]   ;;  %v210_v41 = vmul.bf16 %v209_v35, %v205_v34  ;;  %v231_v52 = vstv %s1850_s11  ;;  %v2324_v34 = vld [vmem:[#allocation12 + $0x358] sm:$0xff]   ;;  %v2323_v35 = vld [vmem:[#allocation12 + $0x390] sm:$0xff]  }
  0x9d   :  { %2086 = vmatprep.subr.bf16.mxu1 %v2265_v56  ;;  %v232_v56 = vpack.c.bf16 %v231_v52, %v231_v52  ;;  %v267_v52 = vstv %s1856_s4 }
  0x9e   :  { %v211_v54 = vadd.bf16 %v210_v41, %v208_v45  ;;  %v2332_v45 = vld [vmem:[#allocation12 + $0x368] sm:$0xff]  }
  0x9f   :  { %2065 = vmatpush3.bf16.msra.mxu0 %v2266_v60  ;;  %v222_v60 = vmul.bf16 %v221_v48, %v217_v49  ;;  %v255_v48 = vstv %s1854_s16  ;;  %v2333_v49 = vld [vmem:[#allocation12 + $0x3e8] sm:$0xff]  }
  0xa0   :  { %2066 = vmatprep.subr.bf16.mxu0 %v2268_v63  ;;  %2087 = vmatpush3.bf16.msra.mxu1 %v2267_v1  ;;  %v2301_v63 = vld [vmem:[#allocation12 + $0x2f0] sm:$0xff]   ;;  %v212_v0 = vmax.bf16 %v2498_v3, %v211_v54  ;;  %v234_v1 = vmul.bf16 %v233_v53, %v229_v55  ;;  %v269_v53 = vld [vmem:[#allocation11] sm:$0xf]  ;;  %v2334_v54 = vld [vmem:[#allocation12 + $0x328] sm:$0xff]   ;;  %v265_v55 = vpack.c.bf16 %v264_v51, %v264_v51 }
  0xa1   :  { %2088 = vmatprep.subr.bf16.mxu1 %v2269_v5  ;;  %v223_v5 = vadd.bf16 %v222_v60, %v220_v50  ;;  %v256_v50 = vpack.c.bf16 %v255_v48, %v255_v48  ;;  %v2336_v60 = vld [vmem:[#allocation12 + $0x370] sm:$0xff]  }
  0xa2   :  { %213 = vst [vmem:[#allocation3 + $0x20] sm:$0xf] %v212_v0  ;;  %v235_v8 = vadd.bf16 %v234_v1, %v232_v56  ;;  %v268_v56 = vpack.c.bf16 %v267_v52, %v267_v52  ;;  %v288_v0 = vstv %s2642_s5  ;;  %v293_v1 = vld [vmem:[#allocation11] sm:$0xf] }
  0xa3   :  { %2067 = vmatpush3.bf16.msra.mxu0 %v2270_v7  ;;  %v2304_v7 = vld [vmem:[#allocation12 + $0x278] sm:$0xff]  }
  0xa4   :  { %2096 = vmatprep.subr.bf16.mxu0 %v2276_v9  ;;  %2089 = vmatpush3.bf16.msra.mxu1 %v2271_v10  ;;  %v2303_v9 = vld [vmem:[#allocation12 + $0x2b0] sm:$0xff]   ;;  %v224_v10 = vmax.bf16 %v2498_v3, %v223_v5  ;;  %v236_v13 = vmax.bf16 %v2498_v3, %v235_v8  ;;  %v289_v5 = vpack.c.bf16 %v288_v0, %v288_v0 }
  0xa5   :  { %2118 = vmatprep.subr.bf16.mxu1 %v2277_v11  ;;  %v247_v11 = vadd.bf16 %v246_v6, %v244_v2  ;;  %v2335_v2 = vld [vmem:[#allocation12 + $0x3a8] sm:$0xff]   ;;  %v291_v6 = vstv %s2644_s19 }
  0xa6   :  { %1500 = vmatmul.mubr.bf16.vlgmr.msra.gmra.mrb[4].mxu0 %v1865_v14  ;;  %v2306_v14 = vld [vmem:[#allocation12 + $0x238] sm:$0xff]   ;;  %225 = vst [vmem:[#allocation3 + $0x24] sm:$0xf] %v224_v10  ;;  %237 = vst [vmem:[#allocation3 + $0x28] sm:$0xf] %v236_v13  ;;  %v292_v10 = vpack.c.bf16 %v291_v6, %v291_v6  ;;  %v294_v13 = vmul.bf16 %v293_v1, %v289_v5 }
  0xa7   :  { %2097 = vmatpush3.bf16.msra.mxu0 %v2278_v12  ;;  %1540 = vmatmul.mubr.bf16.vlgmr.msra.gmra.mrb[4].mxu1 %v1867_v19  ;;  %v2305_v12 = vld [vmem:[#allocation12 + $0x2f8] sm:$0xff]   ;;  %v248_v15 = vmax.bf16 %v2498_v3, %v247_v11  ;;  %v2314_v19 = vld [vmem:[#allocation12 + $0x300] sm:$0xff]   ;;  %v2338_v11 = vld [vmem:[#allocation12 + $0x330] sm:$0xff]  }
  0xa8   :  { %2098 = vmatprep.subr.bf16.mxu0 %v2280_v18  ;;  %2119 = vmatpush3.bf16.msra.mxu1 %v2279_v16  ;;  %v2312_v16 = vld [vmem:[#allocation12 + $0x340] sm:$0xff]  }
  0xa9   :  { %2120 = vmatprep.subr.bf16.mxu1 %v2281_v21  ;;  %249 = vst [vmem:[#allocation3 + $0x2c] sm:$0xf] %v248_v15  ;;  %v2313_v18 = vld [vmem:[#allocation12 + $0x3c0] sm:$0xff]  }
  0xab   :  { %2099 = vmatpush3.bf16.msra.mxu0 %v2282_v22 }
  0xac   :  { %2100 = vmatprep.subr.bf16.mxu0 %v2284_v23  ;;  %2121 = vmatpush3.bf16.msra.mxu1 %v2283_v24  ;;  %v2315_v23 = vld [vmem:[#allocation12 + $0x380] sm:$0xff]  }
  0xad   :  { %2122 = vmatprep.subr.bf16.mxu1 %v2285_v25  ;;  %v303_v20 = vld [vmem:[#allocation3 + $0x20] sm:$0xff]  ;;  %v2316_v25 = vld [vmem:[#allocation12 + $0x348] sm:$0xff]  }
  0xae   :  { %v1869_v21 = vcombine.low %v303_v20, %v303_v20  ;;  %v1870_v22 = vcombine.high %v303_v20, %v303_v20 }
  0xaf   :  { %2101 = vmatpush3.bf16.msra.mxu0 %v2286_v26 }
  0xb0   :  { %2102 = vmatprep.subr.bf16.mxu0 %v2288_v27  ;;  %2123 = vmatpush3.bf16.msra.mxu1 %v2287_v28  ;;  %v304_v24 = vld [vmem:[#allocation3 + $0x28] sm:$0xff] }
  0xb1   :  { %2124 = vmatprep.subr.bf16.mxu1 %v2289_v30  ;;  %1579 = vmatprep.mubr.bf16.mxu0 %v1870_v22  ;;  %v1871_v26 = vcombine.low %v304_v24, %v304_v24  ;;  %v1872_v27 = vcombine.high %v304_v24, %v304_v24  ;;  %v2317_v28 = vld [vmem:[#allocation12 + $0x3c8] sm:$0xff]   ;;  %v2320_v30 = vld [vmem:[#allocation12 + $0x350] sm:$0xff]  }
  0xb3   :  { %2103 = vmatpush3.bf16.msra.mxu0 %v2290_v31  ;;  %1619 = vmatprep.mubr.bf16.mxu1 %v1872_v27  ;;  %v2319_v31 = vld [vmem:[#allocation12 + $0x388] sm:$0xff]  }
  0xb4   :  { %2104 = vmatprep.subr.bf16.mxu0 %v2292_v33  ;;  %2125 = vmatpush3.bf16.msra.mxu1 %v2291_v32  ;;  %v2321_v32 = vld [vmem:[#allocation12 + $0x3d0] sm:$0xff]  }
  0xb5   :  { %2126 = vmatprep.subr.bf16.mxu1 %v2293_v36  ;;  %v2322_v33 = vld [vmem:[#allocation12 + $0x310] sm:$0xff]   ;;  %v252_v36 = vstv %s1853_s15 }
  0xb6   :  { %v253_v41 = vpack.c.bf16 %v252_v36, %v252_v36 }
  0xb7   :  { %2105 = vmatpush3.bf16.msra.mxu0 %v2294_v37  ;;  %v2325_v37 = vld [vmem:[#allocation12 + $0x3d8] sm:$0xff]  }
  0xb8   :  { %2106 = vmatprep.subr.bf16.mxu0 %v2296_v39  ;;  %2127 = vmatpush3.bf16.msra.mxu1 %v2295_v38  ;;  %v2326_v38 = vld [vmem:[#allocation12 + $0x318] sm:$0xff]  }
  0xb9   :  { %2128 = vmatprep.subr.bf16.mxu1 %v2297_v40  ;;  %v2327_v39 = vld [vmem:[#allocation12 + $0x398] sm:$0xff]   ;;  %v2328_v40 = vld [vmem:[#allocation12 + $0x360] sm:$0xff]  }
  0xbb   :  { %2107 = vmatpush3.bf16.msra.mxu0 %v2298_v42  ;;  %v257_v42 = vld [vmem:[#allocation11] sm:$0xf] }
  0xbc   :  { %2108 = vmatprep.subr.bf16.mxu0 %v2300_v44  ;;  %2129 = vmatpush3.bf16.msra.mxu1 %v2299_v59  ;;  %v2330_v44 = vld [vmem:[#allocation12 + $0x320] sm:$0xff]   ;;  %v258_v46 = vmul.bf16 %v257_v42, %v253_v41  ;;  %v281_v59 = vld [vmem:[#allocation11] sm:$0xf] }
  0xbd   :  { %2130 = vmatprep.subr.bf16.mxu1 %v2301_v63  ;;  %v280_v63 = vpack.c.bf16 %v279_v58, %v279_v58 }
  0xbe   :  { %v259_v61 = vadd.bf16 %v258_v46, %v256_v50 }
  0xbf   :  { %2109 = vmatpush3.bf16.msra.mxu0 %v2302_v4  ;;  %v270_v4 = vmul.bf16 %v269_v53, %v265_v55 }
  0xc0   :  { %2110 = vmatprep.subr.bf16.mxu0 %v2304_v7  ;;  %2131 = vmatpush3.bf16.msra.mxu1 %v2303_v9  ;;  %v2337_v7 = vld [vmem:[#allocation12 + $0x3f0] sm:$0xff]   ;;  %v260_v8 = vmax.bf16 %v2498_v3, %v259_v61  ;;  %v282_v9 = vmul.bf16 %v281_v59, %v277_v62 }
  0xc1   :  { %2132 = vmatprep.subr.bf16.mxu1 %v2305_v12  ;;  %v271_v12 = vadd.bf16 %v270_v4, %v268_v56 }
  0xc2   :  { %261 = vst [vmem:[#allocation3 + $0x30] sm:$0xf] %v260_v8  ;;  %v283_v15 = vadd.bf16 %v282_v9, %v280_v63 }
  0xc3   :  { %2111 = vmatpush3.bf16.msra.mxu0 %v2306_v14  ;;  %v2340_v14 = vld [vmem:[#allocation12 + $0x378] sm:$0xff]  }
  0xc4   :  { %2140 = vmatprep.subr.bf16.mxu0 %v2312_v16  ;;  %2133 = vmatpush3.bf16.msra.mxu1 %v2307_v17  ;;  %v2339_v16 = vld [vmem:[#allocation12 + $0x3b0] sm:$0xff]   ;;  %v272_v17 = vmax.bf16 %v2498_v3, %v271_v12  ;;  %v284_v20 = vmax.bf16 %v2498_v3, %v283_v15 }
  0xc5   :  { %2162 = vmatprep.subr.bf16.mxu1 %v2313_v18  ;;  %v295_v18 = vadd.bf16 %v294_v13, %v292_v10 }
  0xc6   :  { %1580 = vmatmul.mubr.bf16.vlgmr.msra.gmra.mrb[8].mxu0 %v1869_v21  ;;  %v2342_v21 = vld [vmem:[#allocation12 + $0x338] sm:$0xff]   ;;  %273 = vst [vmem:[#allocation3 + $0x34] sm:$0xf] %v272_v17  ;;  %285 = vst [vmem:[#allocation3 + $0x38] sm:$0xf] %v284_v20 }
  0xc7   :  { %2141 = vmatpush3.bf16.msra.mxu0 %v2314_v19  ;;  %1620 = vmatmul.mubr.bf16.vlgmr.msra.gmra.mrb[8].mxu1 %v1871_v26  ;;  %v2341_v19 = vld [vmem:[#allocation12 + $0x3f8] sm:$0xff]   ;;  %v296_v22 = vmax.bf16 %v2498_v3, %v295_v18  ;;  %v2499_v3 = vmov 0.0   ;;  %v2005_v17 = vld [vmem:[#allocation14] ss:$0 sm:$0xff] }
  0xc8   :  { %2142 = vmatprep.subr.bf16.mxu0 %v2316_v25  ;;  %2163 = vmatpush3.bf16.msra.mxu1 %v2315_v23  ;;  %v2343_v23 = vld [vmem:[#allocation12 + $0x3b8] sm:$0xff]   ;;  %105 = vst.msk [vmem:[#allocation2] sm:$0xff] %vm104_vm0, %v2499_v3 }
  0xc9   :  { %2164 = vmatprep.subr.bf16.mxu1 %v2317_v28  ;;  %297 = vst [vmem:[#allocation3 + $0x3c] sm:$0xf] %v296_v22  ;;  %v1730_v22 = vlaneseq }
  0xcb   :  { %2143 = vmatpush3.bf16.msra.mxu0 %v2318_v29 }
  0xcc   :  { %2144 = vmatprep.subr.bf16.mxu0 %v2320_v30  ;;  %2165 = vmatpush3.bf16.msra.mxu1 %v2319_v31 }
  0xcd   :  { %2166 = vmatprep.subr.bf16.mxu1 %v2321_v32  ;;  %v305_v24 = vld [vmem:[#allocation3 + $0x30] sm:$0xff] }
  0xce   :  { %v1873_v25 = vcombine.low %v305_v24, %v305_v24  ;;  %v1874_v26 = vcombine.high %v305_v24, %v305_v24 }
  0xcf   :  { %2145 = vmatpush3.bf16.msra.mxu0 %v2322_v33 }
  0xd0   :  { %2146 = vmatprep.subr.bf16.mxu0 %v2324_v34  ;;  %2167 = vmatpush3.bf16.msra.mxu1 %v2323_v35  ;;  %v306_v27 = vld [vmem:[#allocation3 + $0x38] sm:$0xff] }
  0xd1   :  { %2168 = vmatprep.subr.bf16.mxu1 %v2325_v37  ;;  %1659 = vmatprep.mubr.bf16.mxu0 %v1874_v26  ;;  %v1875_v28 = vcombine.low %v306_v27, %v306_v27  ;;  %v1876_v29 = vcombine.high %v306_v27, %v306_v27 }
  0xd3   :  { %2147 = vmatpush3.bf16.msra.mxu0 %v2326_v38  ;;  %1699 = vmatprep.mubr.bf16.mxu1 %v1876_v29 }
  0xd4   :  { %2148 = vmatprep.subr.bf16.mxu0 %v2328_v40  ;;  %2169 = vmatpush3.bf16.msra.mxu1 %v2327_v39  ;;  %v1724_v40 = vld [vmem:[#allocation4] sm:$0x1] }
  0xd5   :  { %2170 = vmatprep.subr.bf16.mxu1 %v2329_v43  ;;  %1727 = vperm.xlu0 %2203, %v1724_v40  }
  0xd7   :  { %2149 = vmatpush3.bf16.msra.mxu0 %v2330_v44 }
  0xd8   :  { %2150 = vmatprep.subr.bf16.mxu0 %v2332_v45  ;;  %2171 = vmatpush3.bf16.msra.mxu1 %v2331_v47 }
  0xd9   :  { %2172 = vmatprep.subr.bf16.mxu1 %v2333_v49 }
  0xdb   :  { %2151 = vmatpush3.bf16.msra.mxu0 %v2334_v54 }
  0xdc   :  { %2152 = vmatprep.subr.bf16.mxu0 %v2336_v60  ;;  %2173 = vmatpush3.bf16.msra.mxu1 %v2335_v2 }
  0xdd   :  { %2174 = vmatprep.subr.bf16.mxu1 %v2337_v7 }
  0xdf   :  { %2153 = vmatpush3.bf16.msra.mxu0 %v2338_v11 }
  0xe0   :  { %2154 = vmatprep.subr.bf16.mxu0 %v2340_v14  ;;  %2175 = vmatpush3.bf16.msra.mxu1 %v2339_v16  ;;  %v298_v14 = vld [vmem:[#allocation2] sm:$0xff] }
  0xe1   :  { %2176 = vmatprep.subr.bf16.mxu1 %v2341_v19 }
  0xe3   :  { %2155 = vmatpush3.bf16.msra.mxu0 %v2342_v21  ;;  %v1723_v21 = vld [vmem:[#allocation15] sm:$0x1] }
  0xe4   :  { %2177 = vmatpush3.bf16.msra.mxu1 %v2343_v23  ;;  %2186 = vmatprep.subr.mxu0 %v2499_v3  ;;  %v1731_v23 = vshrl.u32 %v1730_v22, 7 }
  0xe6   :  { %1660 = vmatmul.mubr.bf16.vlgmr.msra.gmra.mrb[12].mxu0 %v1873_v25  ;;  %v1732_v24 = vsub.s32 0, %v1731_v23 }
  0xe7   :  { %1700 = vmatmul.mubr.bf16.vlgmr.msra.gmra.mrb[12].mxu1 %v1875_v28  ;;  %2188 = vmatprep.mubr.msk.f32.mxu0 %vm2500_vm1, %v2499_v3 }
 0x154   :  { %v1728_v25 = vpop.permute.xlu0 %1727 }
 0x155   :  { %v1733_v26 = vrot.slane %v1728_v25, %v1732_v24 }
 0x159   :  { %v2024_v30 = vpop.f32.mrb[0].mxu0 }
 0x15a   :  { %v2025_v31 = vpop.f32.mrb[1].mxu0  ;;  %v2046_v32 = vpop.f32.mrb[0].mxu1 }
 0x15b   :  { %v2026_v33 = vadd.f32 %v2025_v31, %v2024_v30  ;;  %v2027_v34 = vpop.f32.mrb[2].mxu0  ;;  %v2047_v35 = vpop.f32.mrb[1].mxu1 }
 0x15c   :  { %v2028_v36 = vpop.f32.mrb[3].mxu0  ;;  %v2048_v37 = vadd.f32 %v2047_v35, %v2046_v32  ;;  %v2049_v38 = vpop.f32.mrb[2].mxu1 }
 0x15d   :  { %v2050_v39 = vpop.f32.mrb[3].mxu1 }
 0x15e   :  { %v1462_v41 = vadd.f32 %v2048_v37, %v2026_v33 }
 0x179   :  { %v2068_v42 = vpop.f32.mrb[4].mxu0 }
 0x17a   :  { %v2069_v43 = vpop.f32.mrb[5].mxu0  ;;  %v2090_v44 = vpop.f32.mrb[4].mxu1 }
 0x17b   :  { %v2070_v45 = vadd.f32 %v2069_v43, %v2068_v42  ;;  %v2071_v46 = vpop.f32.mrb[6].mxu0  ;;  %v2091_v47 = vpop.f32.mrb[5].mxu1 }
 0x17c   :  { %v2072_v48 = vpop.f32.mrb[7].mxu0  ;;  %v2092_v50 = vadd.f32 %v2091_v47, %v2090_v44  ;;  %v2093_v51 = vpop.f32.mrb[6].mxu1 }
 0x17d   :  { %v1502_v49 = vadd.f32 %v2070_v45, %v1462_v41  ;;  %v2094_v52 = vpop.f32.mrb[7].mxu1 }
 0x17f   :  { %v1542_v53 = vadd.f32 %v2092_v50, %v1502_v49 }
 0x199   :  { %v2112_v54 = vpop.f32.mrb[8].mxu0 }
 0x19a   :  { %v2113_v55 = vpop.f32.mrb[9].mxu0  ;;  %v2134_v56 = vpop.f32.mrb[8].mxu1 }
 0x19b   :  { %v2114_v57 = vadd.f32 %v2113_v55, %v2112_v54  ;;  %v2115_v58 = vpop.f32.mrb[10].mxu0  ;;  %v2135_v59 = vpop.f32.mrb[9].mxu1 }
 0x19c   :  { %v2116_v60 = vpop.f32.mrb[11].mxu0  ;;  %v2136_v62 = vadd.f32 %v2135_v59, %v2134_v56  ;;  %v2137_v63 = vpop.f32.mrb[10].mxu1 }
 0x19d   :  { %v1582_v61 = vadd.f32 %v2114_v57, %v1542_v53  ;;  %v2138_v0 = vpop.f32.mrb[11].mxu1 }
 0x19f   :  { %v1622_v1 = vadd.f32 %v2136_v62, %v1582_v61 }
 0x1b9   :  { %v2156_v2 = vpop.f32.mrb[12].mxu0 }
 0x1ba   :  { %v2157_v4 = vpop.f32.mrb[13].mxu0  ;;  %v2178_v5 = vpop.f32.mrb[12].mxu1 }
 0x1bb   :  { %v2158_v6 = vadd.f32 %v2157_v4, %v2156_v2  ;;  %v2159_v7 = vpop.f32.mrb[14].mxu0  ;;  %v2179_v8 = vpop.f32.mrb[13].mxu1 }
 0x1bc   :  { %v2160_v9 = vpop.f32.mrb[15].mxu0  ;;  %v2180_v11 = vadd.f32 %v2179_v8, %v2178_v5  ;;  %v2181_v12 = vpop.f32.mrb[14].mxu1 }
 0x1bd   :  { %v1662_v10 = vadd.f32 %v2158_v6, %v1622_v1  ;;  %v2182_v13 = vpop.f32.mrb[15].mxu1 }
 0x1bf   :  { %v1702_v15 = vadd.f32 %v2180_v11, %v1662_v10 }
 0x1c1   :  { %v1707_v16 = vadd.f32 %v1702_v15, %v298_v14 }
 0x1c3   :  { %1709 = vst.msk [vmem:[#allocation2] sm:$0xff] %vm104_vm0, %v1707_v16 }
 0x1ca   :  { %v1713_v18 = vld [vmem:[#allocation2] sm:$0xff] }
 0x1cb   :  { %v1721_v19 = vadd.f32 %v2005_v17, %v1713_v18 }
 0x1cd   :  { %v1722_v20 = vmax.f32 %v1721_v19, 0.0 }
 0x1cf   :  { %2187 = vmatpush3.xpose.msk.msra.mxu0 %vm104_vm0, %v1722_v20 }
 0x1d2   :  { %2189 = vmatmul.mubr.msk.f32.vlgmr.msra.gmra.mrb[16].mxu0 %vm104_vm0, %v1723_v21 }
 0x2a5   :  { %v1806_v27 = vpop.f32.mrb[16].mxu0 }
 0x2a6   :  { %v1807_v28 = vadd.f32 %v1806_v27, %v1733_v26  ;;  %v2190_v29 = vpop.f32.mrb[17].mxu0 }
 0x2a8   :  { %1811 = vst.msk [vmem:[#allocation17] sm:$0x1] %vm1810_vm2, %v1807_v28 }
 0x2a9   :  { %2467 = shalt.err (!%p2464_p0)
}
 0x2aa   :  { %s2468_s25 = scalar_lea.hbm %s2675_s7, 16 }
 0x2ab   :  { %p2469_p1 = scmp.ne.s32.totalorder %s2675_s7, %s2468_s25  ;;  %p2472_p2 = scmp.lt.u32.totalorder %s2468_s25, %s2675_s7 }
 0x2ad   :  { %p2474_p3 = pnand %p2472_p2, %p2469_p1 }
 0x2af   :  { %2477 = shalt.err (!%p2474_p3)
}
 0x2b0   :  { %1821 = dma.vmem_to_hbm [thread:$0]  %s1819_s1, 16, %s2675_s7, [#allocation7]  }
 0x2b1   :  { %2488 = dma.done.wait [#allocation7], 16  }
 0x2b2   :  { %2489 = vsyncadd [#allocation7], 4294967280 }
 0x2b3   :  { %1825 = vsyncpa [#allocation6], 1 }
 0x2b4   :  { %1826 = vsyncpa [#allocation13], 1 }
 0x2b5   :  { %1827 = vsyncpa [#allocation16], 1 }
 0x2b6   :  { %1828 = vsyncpa [#allocation7], 1 }
 0x2b7   :  { %1829 = vsyncpa [#allocation8], 1 }
 0x2b8   :  { %1830 = vsyncpa [#allocation10], 1 }

</bundles_post_ra>
